<compile_context>
chip_gen: v6e
topology: v6e:2x2x1
jax: 0.10.0
libtpu: 0.0.40
codegen_flags: <defaults>
</compile_context>

<pallas_src>
import functools

import jax
import jax.numpy as jnp
from jax.experimental import pallas as pl
from jax.experimental.pallas import tpu as pltpu

NEG_SLOPE = 0.01     # nn.LeakyReLU default
BN_EPS = 1e-5
C_IN = 4             # input channels
C_REAL = 120         # real channel count of the model
C_PAD = 128          # lane-dense padded channel count
KS = 3               # conv kernel size along H ('same' pad of 1)
H0 = 32              # input height: five (2,1) maxpools -> 1 -> Linear(120)
N_CONV = 7
POOL_AFTER = (True, True, True, False, True, False, True)   # p0..p4 placement


def _leaky(y):
    # max(y, 0.01*y): 2 VPU ops instead of cmp+mul+select.
    return jnp.maximum(y, NEG_SLOPE * y)


def _shift_rows(a, H, bb, direction):
    """Shift the batch-stacked (bb*H, C) activation by one row within each
    per-element H block; vacated rows are zero ('same' conv padding)."""
    M, C = a.shape
    zrow = jnp.zeros((1, C), a.dtype)
    if direction > 0:                       # out[m] = a[m-1]
        out = jnp.concatenate([zrow, a[:M - 1]], axis=0)
    else:                                   # out[m] = a[m+1]
        out = jnp.concatenate([a[1:], zrow], axis=0)
    if bb > 1:
        # zero rows that crossed a batch-element boundary (H is a power of 2)
        ridx = jax.lax.broadcasted_iota(jnp.int32, (M, C), 0)
        hidx = ridx & (H - 1)
        bad = 0 if direction > 0 else H - 1
        out = jnp.where(hidx != bad, out, jnp.zeros_like(out))
    return out


def _conv_bn_lrelu(a, cw_ref, cb_ref, li, H, bb):
    """(3,1) 'same' conv + folded BN + LeakyReLU as 3 accumulated bf16 dots."""
    up = _shift_rows(a, H, bb, +1)          # x[h-1]
    dn = _shift_rows(a, H, bb, -1)          # x[h+1]
    y = jnp.dot(a.astype(jnp.bfloat16), cw_ref[li - 1, 1],
                preferred_element_type=jnp.float32)
    y += jnp.dot(up.astype(jnp.bfloat16), cw_ref[li - 1, 0],
                 preferred_element_type=jnp.float32)
    y += jnp.dot(dn.astype(jnp.bfloat16), cw_ref[li - 1, 2],
                 preferred_element_type=jnp.float32)
    return _leaky(y + cb_ref[li])


def _maxpool2(a, sel_ref):
    """MaxPool2d((2,1),(2,1)): pairwise max + 'take even rows' matmul.

    Cross-element wrap rows of the shifted max land on odd rows only, which
    the selection matrix never picks, so no mask is needed here."""
    M, C = a.shape
    assert M % 2 == 0, "MaxPool2d((2,1)) needs an even number of rows"
    zrow = jnp.zeros((1, C), a.dtype)
    nxt = jnp.concatenate([a[1:], zrow], axis=0)      # nxt[m] = a[m+1]
    ym = jnp.maximum(a, nxt)                          # even rows hold pair max
    return jnp.dot(sel_ref[:M // 2, :M], ym,
                   preferred_element_type=jnp.float32)


def _cnn7_kernel(bb, x_ref, w0_ref, cw_ref, cb_ref, sel_ref,
                 w1_ref, t1_ref, w2_ref, b2_ref, o_ref):
    # x_ref: (bb*H0, C_PAD) bf16, layer-0 im2col already packed in the wrapper.
    a = jnp.dot(x_ref[...], w0_ref[...], preferred_element_type=jnp.float32)
    a = _leaky(a + cb_ref[0])
    H = H0
    if POOL_AFTER[0]:
        a = _maxpool2(a, sel_ref)
        H //= 2
    for li in range(1, N_CONV):             # static, fully unrolled
        a = _conv_bn_lrelu(a, cw_ref, cb_ref, li, H, bb)
        if POOL_AFTER[li]:
            a = _maxpool2(a, sel_ref)
            H //= 2
    assert H == 1 and a.shape == (bb, C_PAD)
    # Head: Linear(120,120) (BN1d scale folded into columns) + bias + LeakyReLU
    h = jnp.dot(a.astype(jnp.bfloat16), w1_ref[...],
                preferred_element_type=jnp.float32)
    h = _leaky(h + t1_ref[...])
    # Linear(120,1) as a lane reduction (avoids an N=1 MXU pass).
    o_ref[...] = (jnp.sum(h * w2_ref[...], axis=-1, keepdims=True)
                  + b2_ref[...])


def cnn7_forward(x_nchw, params, block_b=8):
    (w0, conv_w, conv_b), (w1, t1, w2, b2) = params
    B, cin, H, W = x_nchw.shape
    assert cin == C_IN and H == H0 and W == 1
    bb = max(1, min(block_b, B))            # batch elements stacked per step
    G = -(-B // bb)
    Bp = G * bb
    # NCHW (B, Cin, H, 1) -> (B, H, Cin); pad batch to a multiple of bb.
    x = jnp.transpose(x_nchw[..., 0], (0, 2, 1))
    if Bp != B:
        x = jnp.pad(x, ((0, Bp - B), (0, 0), (0, 0)))
    # Layer-0 im2col in the wrapper: 3 taps x 4 channels -> 12 cols, padded
    # once to 128 lanes so conv0 is a single lane-dense K=128 dot.
    xp = jnp.pad(x, ((0, 0), (1, 1), (0, 0)))
    cols = jnp.concatenate(
        [xp[:, 0:H0], xp[:, 1:H0 + 1], xp[:, 2:H0 + 2]], axis=-1)
    cols = jnp.pad(cols, ((0, 0), (0, 0), (0, C_PAD - KS * C_IN)))
    cols = cols.reshape(Bp * H0, C_PAD).astype(jnp.bfloat16)
    # Pool compaction matrix sel[r, 2r] = 1, shared by all 5 pools.
    m_out = bb * (H0 // 2)
    sel = jnp.zeros((m_out, bb * H0), jnp.float32)
    sel = sel.at[jnp.arange(m_out), 2 * jnp.arange(m_out)].set(1.0)

    out = pl.pallas_call(
        functools.partial(_cnn7_kernel, bb),
        out_shape=jax.ShapeDtypeStruct((G, bb, 1), jnp.float32),
        grid=(G,),
        in_specs=[
            pl.BlockSpec((bb * H0, C_PAD), lambda g: (g, 0)),
            pl.BlockSpec((C_PAD, C_PAD), lambda g: (0, 0)),
            pl.BlockSpec((N_CONV - 1, KS, C_PAD, C_PAD),
                         lambda g: (0, 0, 0, 0)),
            pl.BlockSpec((N_CONV, 1, C_PAD), lambda g: (0, 0, 0)),
            pl.BlockSpec((m_out, bb * H0), lambda g: (0, 0)),
            pl.BlockSpec((C_PAD, C_PAD), lambda g: (0, 0)),
            pl.BlockSpec((1, C_PAD), lambda g: (0, 0)),
            pl.BlockSpec((1, C_PAD), lambda g: (0, 0)),
            pl.BlockSpec((1, 1), lambda g: (0, 0)),
        ],
        out_specs=pl.BlockSpec((None, bb, 1), lambda g: (g, 0, 0)),
        compiler_params=pltpu.CompilerParams(
            dimension_semantics=("parallel",)),
    )(cols, w0, conv_w, conv_b, sel, w1, t1, w2, b2)
    return out.reshape(Bp, 1)[:B]


# --------------------------------------------------------------------------
# Deterministic synthetic parameters.  BN scale is folded into the weights,
# the remaining shift into the bias; everything is padded to 128 lanes with
# zeros (pad bias = 0 keeps pad lanes exactly 0 through LeakyReLU).
# --------------------------------------------------------------------------
def make_conv_params(key, cin, cout=C_REAL):
    k = jax.random.split(key, 6)
    bound = 1.0 / ((cin * KS) ** 0.5)
    w = jax.random.uniform(k[0], (KS, cin, cout), jnp.float32, -bound, bound)
    b = jax.random.uniform(k[1], (cout,), jnp.float32, -bound, bound)
    gamma = jax.random.uniform(k[2], (cout,), jnp.float32, 0.5, 1.5)
    beta = jax.random.uniform(k[3], (cout,), jnp.float32, -0.1, 0.1)
    mean = jax.random.normal(k[4], (cout,), jnp.float32) * 0.1
    var = jax.random.uniform(k[5], (cout,), jnp.float32, 0.5, 1.5)
    s = gamma / jnp.sqrt(var + BN_EPS)
    w_folded = w * s[None, None, :]                      # scale into weights
    bias = ((b - mean) * s + beta).reshape(1, cout)
    return w_folded, bias


def make_head_params(key, d=C_REAL):
    k = jax.random.split(key, 8)
    bound = 1.0 / (d ** 0.5)
    w1 = jax.random.uniform(k[0], (d, d), jnp.float32, -bound, bound)
    b1 = jax.random.uniform(k[1], (d,), jnp.float32, -bound, bound)
    gamma = jax.random.uniform(k[2], (d,), jnp.float32, 0.5, 1.5)
    beta = jax.random.uniform(k[3], (d,), jnp.float32, -0.1, 0.1)
    mean = jax.random.normal(k[4], (d,), jnp.float32) * 0.1
    var = jax.random.uniform(k[5], (d,), jnp.float32, 0.5, 1.5)
    s = gamma / jnp.sqrt(var + BN_EPS)
    w1f = w1 * s[None, :]
    t1 = ((b1 - mean) * s + beta).reshape(1, d)
    w2 = jax.random.uniform(k[6], (d,), jnp.float32, -bound, bound)
    b2 = jax.random.uniform(k[7], (1, 1), jnp.float32, -bound, bound)
    w1p = jnp.zeros((C_PAD, C_PAD), jnp.float32).at[:d, :d].set(w1f)
    t1p = jnp.zeros((1, C_PAD), jnp.float32).at[:, :d].set(t1)
    w2p = jnp.zeros((1, C_PAD), jnp.float32).at[:, :d].set(w2.reshape(1, d))
    return w1p.astype(jnp.bfloat16), t1p, w2p, b2


def cnn7_reference(x_nchw, params):
    """Straightforward per-element pure-JAX reference of the same forward."""
    (w0, conv_w, conv_b), (w1, t1, w2, b2) = params
    w0 = w0.astype(jnp.float32)
    conv_w = conv_w.astype(jnp.float32)
    w1 = w1.astype(jnp.float32)
    B = x_nchw.shape[0]
    x = jnp.transpose(x_nchw[..., 0], (0, 2, 1))                 # (B, H, 4)
    xp = jnp.pad(x, ((0, 0), (1, 1), (0, 0)))
    cols = jnp.concatenate(
        [xp[:, 0:H0], xp[:, 1:H0 + 1], xp[:, 2:H0 + 2]], axis=-1)
    cols = jnp.pad(cols, ((0, 0), (0, 0), (0, C_PAD - KS * C_IN)))

    def lrelu(y):
        return jnp.maximum(y, NEG_SLOPE * y)

    outs = []
    for e in range(B):
        y = cols[e] @ w0 + conv_b[0]
        a = lrelu(y)
        if POOL_AFTER[0]:
            a = jnp.maximum(a[0::2], a[1::2])
        for li in range(1, N_CONV):
            z = jnp.zeros((1, C_PAD), jnp.float32)
            up = jnp.concatenate([z, a[:-1]], axis=0)
            dn = jnp.concatenate([a[1:], z], axis=0)
            y = (up @ conv_w[li - 1, 0] + a @ conv_w[li - 1, 1]
                 + dn @ conv_w[li - 1, 2] + conv_b[li])
            a = lrelu(y)
            if POOL_AFTER[li]:
                a = jnp.maximum(a[0::2], a[1::2])
        h = lrelu(a @ w1 + t1)
        outs.append(jnp.sum(h * w2, axis=-1, keepdims=True) + b2)
    return jnp.concatenate(outs, axis=0)


if __name__ == "__main__":
    key = jax.random.PRNGKey(0)
    kx, k0, k1, k2, k3, k4, k5, k6, kh = jax.random.split(key, 9)

    # Input: (B, C, H, 1) NCHW with H=32 so five (2,1) maxpools feed Linear(120).
    x = jax.random.normal(kx, (2, C_IN, H0, 1), jnp.float32)

    # Layer 0 (4 -> 120): pack (tap, cin) into the first 12 im2col rows.
    w0f, b0 = make_conv_params(k0, C_IN)
    w0p = (jnp.zeros((C_PAD, C_PAD), jnp.float32)
           .at[:KS * C_IN, :C_REAL].set(w0f.reshape(KS * C_IN, C_REAL))
           .astype(jnp.bfloat16))
    conv_b_list = [jnp.zeros((1, C_PAD), jnp.float32).at[:, :C_REAL].set(b0)]
    # Layers 1..6 (120 -> 120): per-tap (128, 128) matrices.
    cw_list = []
    for k in (k1, k2, k3, k4, k5, k6):
        wf, b = make_conv_params(k, C_REAL)
        wp = (jnp.zeros((KS, C_PAD, C_PAD), jnp.float32)
              .at[:, :C_REAL, :C_REAL].set(wf))
        cw_list.append(wp)
        conv_b_list.append(
            jnp.zeros((1, C_PAD), jnp.float32).at[:, :C_REAL].set(b))
    conv_w = jnp.stack(cw_list).astype(jnp.bfloat16)   # (6, 3, 128, 128)
    conv_b = jnp.stack(conv_b_list)                    # (7, 1, 128)
    head = make_head_params(kh)

    # TODO(synk): Dropout is eval-mode identity; train-mode RNG masking and
    # live BatchNorm statistics are not implemented.
    params = ((w0p, conv_w, conv_b), head)

    out = jax.jit(cnn7_forward)(x, params)
    out = jax.block_until_ready(out)
    assert out.shape == (2, 1) and out.dtype == jnp.float32

    ref = cnn7_reference(x, params)
    assert bool(jnp.allclose(out, ref, rtol=5e-2, atol=5e-2)), (out, ref)
    print("KERNEL_OK")
</pallas_src>

<mosaic_0001>
module attributes {stable_mosaic.version = 11 : i64} {
  func.func @_cnn7_kernel(%arg0: i32, %arg1: memref<64x128xbf16, #tpu.memory_space<vmem>>, %arg2: memref<128x128xbf16, #tpu.memory_space<vmem>>, %arg3: memref<6x3x128x128xbf16, #tpu.memory_space<vmem>>, %arg4: memref<7x1x128xf32, #tpu.memory_space<vmem>>, %arg5: memref<32x64xf32, #tpu.memory_space<vmem>>, %arg6: memref<128x128xbf16, #tpu.memory_space<vmem>>, %arg7: memref<1x128xf32, #tpu.memory_space<vmem>>, %arg8: memref<1x128xf32, #tpu.memory_space<vmem>>, %arg9: memref<1x1xf32, #tpu.memory_space<vmem>>, %arg10: memref<1x2x1xf32, #tpu.memory_space<vmem>>) attributes {dimension_semantics = [#tpu.dimension_semantics<parallel>], iteration_bounds = array<i64: 1>, scalar_prefetch = 0 : i64, scratch_operands = 0 : i64, tpu.core_type = #tpu.core_type<tc>, window_params = [{transform_indices = @transform_0, window_bounds = array<i64: 64, 128>}, {pipeline_mode = #tpu.pipeline_mode<synchronous>, transform_indices = @transform_1, window_bounds = array<i64: 128, 128>}, {pipeline_mode = #tpu.pipeline_mode<synchronous>, transform_indices = @transform_2, window_bounds = array<i64: 6, 3, 128, 128>}, {pipeline_mode = #tpu.pipeline_mode<synchronous>, transform_indices = @transform_3, window_bounds = array<i64: 7, 1, 128>}, {pipeline_mode = #tpu.pipeline_mode<synchronous>, transform_indices = @transform_4, window_bounds = array<i64: 32, 64>}, {pipeline_mode = #tpu.pipeline_mode<synchronous>, transform_indices = @transform_5, window_bounds = array<i64: 128, 128>}, {pipeline_mode = #tpu.pipeline_mode<synchronous>, transform_indices = @transform_6, window_bounds = array<i64: 1, 128>}, {pipeline_mode = #tpu.pipeline_mode<synchronous>, transform_indices = @transform_7, window_bounds = array<i64: 1, 128>}, {pipeline_mode = #tpu.pipeline_mode<synchronous>, transform_indices = @transform_8, window_bounds = array<i64: 1, 1>}, {transform_indices = @transform_9, window_bounds = array<i64: 1, 2, 1>}]} {
    %c0 = arith.constant 0 : index
    %c0_0 = arith.constant 0 : index
    %0 = vector.load %arg1[%c0, %c0_0] : memref<64x128xbf16, #tpu.memory_space<vmem>>, vector<64x128xbf16>
    %c0_1 = arith.constant 0 : index
    %c0_2 = arith.constant 0 : index
    %1 = vector.load %arg2[%c0_1, %c0_2] : memref<128x128xbf16, #tpu.memory_space<vmem>>, vector<128x128xbf16>
    %cst = arith.constant dense<0.000000e+00> : vector<64x128xf32>
    %2 = tpu.matmul %0, %1, %cst {dimension_numbers = #tpu.dot_dimension_numbers<[1], [0], [0], [1], [0, 0, 1, 1], [], []>} : vector<64x128xbf16>, vector<128x128xbf16>, vector<64x128xf32> -> vector<64x128xf32>
    %c0_3 = arith.constant 0 : index
    %c0_4 = arith.constant 0 : index
    %c0_5 = arith.constant 0 : index
    %3 = vector.load %arg4[%c0_3, %c0_4, %c0_5] : memref<7x1x128xf32, #tpu.memory_space<vmem>>, vector<1x1x128xf32>
    %4 = vector.shape_cast %3 : vector<1x1x128xf32> to vector<1x128xf32>
    %5 = vector.broadcast %4 : vector<1x128xf32> to vector<64x128xf32>
    %6 = arith.addf %2, %5 : vector<64x128xf32>
    %cst_6 = arith.constant 0.00999999977 : f32
    %7 = vector.broadcast %cst_6 : f32 to vector<64x128xf32>
    %8 = arith.mulf %7, %6 : vector<64x128xf32>
    %9 = arith.maximumf %6, %8 : vector<64x128xf32>
    %cst_7 = arith.constant 0.000000e+00 : f32
    %10 = vector.broadcast %cst_7 : f32 to vector<1x128xf32>
    %11 = vector.extract_strided_slice %9 {offsets = [1, 0], sizes = [63, 128], strides = [1, 1]} : vector<64x128xf32> to vector<63x128xf32>
    %12 = tpu.concatenate %11, %10 in 0 : vector<63x128xf32>, vector<1x128xf32> -> vector<64x128xf32>
    %13 = arith.maximumf %9, %12 : vector<64x128xf32>
    %c0_8 = arith.constant 0 : index
    %c0_9 = arith.constant 0 : index
    %14 = vector.load %arg5[%c0_8, %c0_9] : memref<32x64xf32, #tpu.memory_space<vmem>>, vector<32x64xf32>
    %cst_10 = arith.constant dense<0.000000e+00> : vector<32x128xf32>
    %15 = tpu.matmul %14, %13, %cst_10 {dimension_numbers = #tpu.dot_dimension_numbers<[1], [0], [0], [1], [0, 0, 1, 1], [], []>} : vector<32x64xf32>, vector<64x128xf32>, vector<32x128xf32> -> vector<32x128xf32>
    %cst_11 = arith.constant 0.000000e+00 : f32
    %16 = vector.broadcast %cst_11 : f32 to vector<1x128xf32>
    %17 = vector.extract_strided_slice %15 {offsets = [0, 0], sizes = [31, 128], strides = [1, 1]} : vector<32x128xf32> to vector<31x128xf32>
    %18 = tpu.concatenate %16, %17 in 0 : vector<1x128xf32>, vector<31x128xf32> -> vector<32x128xf32>
    %19 = tpu.iota {dimensions = array<i32: 0>} : vector<32x128xi32>
    %c15_i32 = arith.constant 15 : i32
    %20 = vector.broadcast %c15_i32 : i32 to vector<32x128xi32>
    %21 = arith.andi %19, %20 : vector<32x128xi32>
    %c0_i32 = arith.constant 0 : i32
    %22 = vector.broadcast %c0_i32 : i32 to vector<32x128xi32>
    %23 = arith.cmpi ne, %21, %22 : vector<32x128xi32>
    %cst_12 = arith.constant 0.000000e+00 : f32
    %24 = vector.broadcast %cst_12 : f32 to vector<32x128xf32>
    %25 = arith.select %23, %18, %24 : vector<32x128xi1>, vector<32x128xf32>
    %cst_13 = arith.constant 0.000000e+00 : f32
    %26 = vector.broadcast %cst_13 : f32 to vector<1x128xf32>
    %27 = vector.extract_strided_slice %15 {offsets = [1, 0], sizes = [31, 128], strides = [1, 1]} : vector<32x128xf32> to vector<31x128xf32>
    %28 = tpu.concatenate %27, %26 in 0 : vector<31x128xf32>, vector<1x128xf32> -> vector<32x128xf32>
    %29 = tpu.iota {dimensions = array<i32: 0>} : vector<32x128xi32>
    %c15_i32_14 = arith.constant 15 : i32
    %30 = vector.broadcast %c15_i32_14 : i32 to vector<32x128xi32>
    %31 = arith.andi %29, %30 : vector<32x128xi32>
    %c15_i32_15 = arith.constant 15 : i32
    %32 = vector.broadcast %c15_i32_15 : i32 to vector<32x128xi32>
    %33 = arith.cmpi ne, %31, %32 : vector<32x128xi32>
    %cst_16 = arith.constant 0.000000e+00 : f32
    %34 = vector.broadcast %cst_16 : f32 to vector<32x128xf32>
    %35 = arith.select %33, %28, %34 : vector<32x128xi1>, vector<32x128xf32>
    %36 = arith.truncf %15 : vector<32x128xf32> to vector<32x128xbf16>
    %c0_17 = arith.constant 0 : index
    %c1 = arith.constant 1 : index
    %c0_18 = arith.constant 0 : index
    %c0_19 = arith.constant 0 : index
    %37 = vector.load %arg3[%c0_17, %c1, %c0_18, %c0_19] : memref<6x3x128x128xbf16, #tpu.memory_space<vmem>>, vector<1x1x128x128xbf16>
    %38 = vector.shape_cast %37 : vector<1x1x128x128xbf16> to vector<128x128xbf16>
    %cst_20 = arith.constant dense<0.000000e+00> : vector<32x128xf32>
    %39 = tpu.matmul %36, %38, %cst_20 {dimension_numbers = #tpu.dot_dimension_numbers<[1], [0], [0], [1], [0, 0, 1, 1], [], []>} : vector<32x128xbf16>, vector<128x128xbf16>, vector<32x128xf32> -> vector<32x128xf32>
    %40 = arith.truncf %25 : vector<32x128xf32> to vector<32x128xbf16>
    %c0_21 = arith.constant 0 : index
    %c0_22 = arith.constant 0 : index
    %c0_23 = arith.constant 0 : index
    %c0_24 = arith.constant 0 : index
    %41 = vector.load %arg3[%c0_21, %c0_22, %c0_23, %c0_24] : memref<6x3x128x128xbf16, #tpu.memory_space<vmem>>, vector<1x1x128x128xbf16>
    %42 = vector.shape_cast %41 : vector<1x1x128x128xbf16> to vector<128x128xbf16>
    %cst_25 = arith.constant dense<0.000000e+00> : vector<32x128xf32>
    %43 = tpu.matmul %40, %42, %cst_25 {dimension_numbers = #tpu.dot_dimension_numbers<[1], [0], [0], [1], [0, 0, 1, 1], [], []>} : vector<32x128xbf16>, vector<128x128xbf16>, vector<32x128xf32> -> vector<32x128xf32>
    %44 = arith.addf %39, %43 : vector<32x128xf32>
    %45 = arith.truncf %35 : vector<32x128xf32> to vector<32x128xbf16>
    %c0_26 = arith.constant 0 : index
    %c2 = arith.constant 2 : index
    %c0_27 = arith.constant 0 : index
    %c0_28 = arith.constant 0 : index
    %46 = vector.load %arg3[%c0_26, %c2, %c0_27, %c0_28] : memref<6x3x128x128xbf16, #tpu.memory_space<vmem>>, vector<1x1x128x128xbf16>
    %47 = vector.shape_cast %46 : vector<1x1x128x128xbf16> to vector<128x128xbf16>
    %cst_29 = arith.constant dense<0.000000e+00> : vector<32x128xf32>
    %48 = tpu.matmul %45, %47, %cst_29 {dimension_numbers = #tpu.dot_dimension_numbers<[1], [0], [0], [1], [0, 0, 1, 1], [], []>} : vector<32x128xbf16>, vector<128x128xbf16>, vector<32x128xf32> -> vector<32x128xf32>
    %49 = arith.addf %44, %48 : vector<32x128xf32>
    %c1_30 = arith.constant 1 : index
    %c0_31 = arith.constant 0 : index
    %c0_32 = arith.constant 0 : index
    %50 = vector.load %arg4[%c1_30, %c0_31, %c0_32] : memref<7x1x128xf32, #tpu.memory_space<vmem>>, vector<1x1x128xf32>
    %51 = vector.shape_cast %50 : vector<1x1x128xf32> to vector<1x128xf32>
    %52 = vector.broadcast %51 : vector<1x128xf32> to vector<32x128xf32>
    %53 = arith.addf %49, %52 : vector<32x128xf32>
    %cst_33 = arith.constant 0.00999999977 : f32
    %54 = vector.broadcast %cst_33 : f32 to vector<32x128xf32>
    %55 = arith.mulf %54, %53 : vector<32x128xf32>
    %56 = arith.maximumf %53, %55 : vector<32x128xf32>
    %cst_34 = arith.constant 0.000000e+00 : f32
    %57 = vector.broadcast %cst_34 : f32 to vector<1x128xf32>
    %58 = vector.extract_strided_slice %56 {offsets = [1, 0], sizes = [31, 128], strides = [1, 1]} : vector<32x128xf32> to vector<31x128xf32>
    %59 = tpu.concatenate %58, %57 in 0 : vector<31x128xf32>, vector<1x128xf32> -> vector<32x128xf32>
    %60 = arith.maximumf %56, %59 : vector<32x128xf32>
    %c0_35 = arith.constant 0 : index
    %c0_36 = arith.constant 0 : index
    %61 = vector.load %arg5[%c0_35, %c0_36] : memref<32x64xf32, #tpu.memory_space<vmem>>, vector<16x32xf32>
    %cst_37 = arith.constant dense<0.000000e+00> : vector<16x128xf32>
    %62 = tpu.matmul %61, %60, %cst_37 {dimension_numbers = #tpu.dot_dimension_numbers<[1], [0], [0], [1], [0, 0, 1, 1], [], []>} : vector<16x32xf32>, vector<32x128xf32>, vector<16x128xf32> -> vector<16x128xf32>
    %cst_38 = arith.constant 0.000000e+00 : f32
    %63 = vector.broadcast %cst_38 : f32 to vector<1x128xf32>
    %64 = vector.extract_strided_slice %62 {offsets = [0, 0], sizes = [15, 128], strides = [1, 1]} : vector<16x128xf32> to vector<15x128xf32>
    %65 = tpu.concatenate %63, %64 in 0 : vector<1x128xf32>, vector<15x128xf32> -> vector<16x128xf32>
    %66 = tpu.iota {dimensions = array<i32: 0>} : vector<16x128xi32>
    %c7_i32 = arith.constant 7 : i32
    %67 = vector.broadcast %c7_i32 : i32 to vector<16x128xi32>
    %68 = arith.andi %66, %67 : vector<16x128xi32>
    %c0_i32_39 = arith.constant 0 : i32
    %69 = vector.broadcast %c0_i32_39 : i32 to vector<16x128xi32>
    %70 = arith.cmpi ne, %68, %69 : vector<16x128xi32>
    %cst_40 = arith.constant 0.000000e+00 : f32
    %71 = vector.broadcast %cst_40 : f32 to vector<16x128xf32>
    %72 = arith.select %70, %65, %71 : vector<16x128xi1>, vector<16x128xf32>
    %cst_41 = arith.constant 0.000000e+00 : f32
    %73 = vector.broadcast %cst_41 : f32 to vector<1x128xf32>
    %74 = vector.extract_strided_slice %62 {offsets = [1, 0], sizes = [15, 128], strides = [1, 1]} : vector<16x128xf32> to vector<15x128xf32>
    %75 = tpu.concatenate %74, %73 in 0 : vector<15x128xf32>, vector<1x128xf32> -> vector<16x128xf32>
    %76 = tpu.iota {dimensions = array<i32: 0>} : vector<16x128xi32>
    %c7_i32_42 = arith.constant 7 : i32
    %77 = vector.broadcast %c7_i32_42 : i32 to vector<16x128xi32>
    %78 = arith.andi %76, %77 : vector<16x128xi32>
    %c7_i32_43 = arith.constant 7 : i32
    %79 = vector.broadcast %c7_i32_43 : i32 to vector<16x128xi32>
    %80 = arith.cmpi ne, %78, %79 : vector<16x128xi32>
    %cst_44 = arith.constant 0.000000e+00 : f32
    %81 = vector.broadcast %cst_44 : f32 to vector<16x128xf32>
    %82 = arith.select %80, %75, %81 : vector<16x128xi1>, vector<16x128xf32>
    %83 = arith.truncf %62 : vector<16x128xf32> to vector<16x128xbf16>
    %c1_45 = arith.constant 1 : index
    %c1_46 = arith.constant 1 : index
    %c0_47 = arith.constant 0 : index
    %c0_48 = arith.constant 0 : index
    %84 = vector.load %arg3[%c1_45, %c1_46, %c0_47, %c0_48] : memref<6x3x128x128xbf16, #tpu.memory_space<vmem>>, vector<1x1x128x128xbf16>
    %85 = vector.shape_cast %84 : vector<1x1x128x128xbf16> to vector<128x128xbf16>
    %cst_49 = arith.constant dense<0.000000e+00> : vector<16x128xf32>
    %86 = tpu.matmul %83, %85, %cst_49 {dimension_numbers = #tpu.dot_dimension_numbers<[1], [0], [0], [1], [0, 0, 1, 1], [], []>} : vector<16x128xbf16>, vector<128x128xbf16>, vector<16x128xf32> -> vector<16x128xf32>
    %87 = arith.truncf %72 : vector<16x128xf32> to vector<16x128xbf16>
    %c1_50 = arith.constant 1 : index
    %c0_51 = arith.constant 0 : index
    %c0_52 = arith.constant 0 : index
    %c0_53 = arith.constant 0 : index
    %88 = vector.load %arg3[%c1_50, %c0_51, %c0_52, %c0_53] : memref<6x3x128x128xbf16, #tpu.memory_space<vmem>>, vector<1x1x128x128xbf16>
    %89 = vector.shape_cast %88 : vector<1x1x128x128xbf16> to vector<128x128xbf16>
    %cst_54 = arith.constant dense<0.000000e+00> : vector<16x128xf32>
    %90 = tpu.matmul %87, %89, %cst_54 {dimension_numbers = #tpu.dot_dimension_numbers<[1], [0], [0], [1], [0, 0, 1, 1], [], []>} : vector<16x128xbf16>, vector<128x128xbf16>, vector<16x128xf32> -> vector<16x128xf32>
    %91 = arith.addf %86, %90 : vector<16x128xf32>
    %92 = arith.truncf %82 : vector<16x128xf32> to vector<16x128xbf16>
    %c1_55 = arith.constant 1 : index
    %c2_56 = arith.constant 2 : index
    %c0_57 = arith.constant 0 : index
    %c0_58 = arith.constant 0 : index
    %93 = vector.load %arg3[%c1_55, %c2_56, %c0_57, %c0_58] : memref<6x3x128x128xbf16, #tpu.memory_space<vmem>>, vector<1x1x128x128xbf16>
    %94 = vector.shape_cast %93 : vector<1x1x128x128xbf16> to vector<128x128xbf16>
    %cst_59 = arith.constant dense<0.000000e+00> : vector<16x128xf32>
    %95 = tpu.matmul %92, %94, %cst_59 {dimension_numbers = #tpu.dot_dimension_numbers<[1], [0], [0], [1], [0, 0, 1, 1], [], []>} : vector<16x128xbf16>, vector<128x128xbf16>, vector<16x128xf32> -> vector<16x128xf32>
    %96 = arith.addf %91, %95 : vector<16x128xf32>
    %c2_60 = arith.constant 2 : index
    %c0_61 = arith.constant 0 : index
    %c0_62 = arith.constant 0 : index
    %97 = vector.load %arg4[%c2_60, %c0_61, %c0_62] : memref<7x1x128xf32, #tpu.memory_space<vmem>>, vector<1x1x128xf32>
    %98 = vector.shape_cast %97 : vector<1x1x128xf32> to vector<1x128xf32>
    %99 = vector.broadcast %98 : vector<1x128xf32> to vector<16x128xf32>
    %100 = arith.addf %96, %99 : vector<16x128xf32>
    %cst_63 = arith.constant 0.00999999977 : f32
    %101 = vector.broadcast %cst_63 : f32 to vector<16x128xf32>
    %102 = arith.mulf %101, %100 : vector<16x128xf32>
    %103 = arith.maximumf %100, %102 : vector<16x128xf32>
    %cst_64 = arith.constant 0.000000e+00 : f32
    %104 = vector.broadcast %cst_64 : f32 to vector<1x128xf32>
    %105 = vector.extract_strided_slice %103 {offsets = [1, 0], sizes = [15, 128], strides = [1, 1]} : vector<16x128xf32> to vector<15x128xf32>
    %106 = tpu.concatenate %105, %104 in 0 : vector<15x128xf32>, vector<1x128xf32> -> vector<16x128xf32>
    %107 = arith.maximumf %103, %106 : vector<16x128xf32>
    %c0_65 = arith.constant 0 : index
    %c0_66 = arith.constant 0 : index
    %108 = vector.load %arg5[%c0_65, %c0_66] : memref<32x64xf32, #tpu.memory_space<vmem>>, vector<8x16xf32>
    %cst_67 = arith.constant dense<0.000000e+00> : vector<8x128xf32>
    %109 = tpu.matmul %108, %107, %cst_67 {dimension_numbers = #tpu.dot_dimension_numbers<[1], [0], [0], [1], [0, 0, 1, 1], [], []>} : vector<8x16xf32>, vector<16x128xf32>, vector<8x128xf32> -> vector<8x128xf32>
    %cst_68 = arith.constant 0.000000e+00 : f32
    %110 = vector.broadcast %cst_68 : f32 to vector<1x128xf32>
    %111 = vector.extract_strided_slice %109 {offsets = [0, 0], sizes = [7, 128], strides = [1, 1]} : vector<8x128xf32> to vector<7x128xf32>
    %112 = tpu.concatenate %110, %111 in 0 : vector<1x128xf32>, vector<7x128xf32> -> vector<8x128xf32>
    %113 = tpu.iota {dimensions = array<i32: 0>} : vector<8x128xi32>
    %c3_i32 = arith.constant 3 : i32
    %114 = vector.broadcast %c3_i32 : i32 to vector<8x128xi32>
    %115 = arith.andi %113, %114 : vector<8x128xi32>
    %c0_i32_69 = arith.constant 0 : i32
    %116 = vector.broadcast %c0_i32_69 : i32 to vector<8x128xi32>
    %117 = arith.cmpi ne, %115, %116 : vector<8x128xi32>
    %cst_70 = arith.constant 0.000000e+00 : f32
    %118 = vector.broadcast %cst_70 : f32 to vector<8x128xf32>
    %119 = arith.select %117, %112, %118 : vector<8x128xi1>, vector<8x128xf32>
    %cst_71 = arith.constant 0.000000e+00 : f32
    %120 = vector.broadcast %cst_71 : f32 to vector<1x128xf32>
    %121 = vector.extract_strided_slice %109 {offsets = [1, 0], sizes = [7, 128], strides = [1, 1]} : vector<8x128xf32> to vector<7x128xf32>
    %122 = tpu.concatenate %121, %120 in 0 : vector<7x128xf32>, vector<1x128xf32> -> vector<8x128xf32>
    %123 = tpu.iota {dimensions = array<i32: 0>} : vector<8x128xi32>
    %c3_i32_72 = arith.constant 3 : i32
    %124 = vector.broadcast %c3_i32_72 : i32 to vector<8x128xi32>
    %125 = arith.andi %123, %124 : vector<8x128xi32>
    %c3_i32_73 = arith.constant 3 : i32
    %126 = vector.broadcast %c3_i32_73 : i32 to vector<8x128xi32>
    %127 = arith.cmpi ne, %125, %126 : vector<8x128xi32>
    %cst_74 = arith.constant 0.000000e+00 : f32
    %128 = vector.broadcast %cst_74 : f32 to vector<8x128xf32>
    %129 = arith.select %127, %122, %128 : vector<8x128xi1>, vector<8x128xf32>
    %130 = arith.truncf %109 : vector<8x128xf32> to vector<8x128xbf16>
    %c2_75 = arith.constant 2 : index
    %c1_76 = arith.constant 1 : index
    %c0_77 = arith.constant 0 : index
    %c0_78 = arith.constant 0 : index
    %131 = vector.load %arg3[%c2_75, %c1_76, %c0_77, %c0_78] : memref<6x3x128x128xbf16, #tpu.memory_space<vmem>>, vector<1x1x128x128xbf16>
    %132 = vector.shape_cast %131 : vector<1x1x128x128xbf16> to vector<128x128xbf16>
    %cst_79 = arith.constant dense<0.000000e+00> : vector<8x128xf32>
    %133 = tpu.matmul %130, %132, %cst_79 {dimension_numbers = #tpu.dot_dimension_numbers<[1], [0], [0], [1], [0, 0, 1, 1], [], []>} : vector<8x128xbf16>, vector<128x128xbf16>, vector<8x128xf32> -> vector<8x128xf32>
    %134 = arith.truncf %119 : vector<8x128xf32> to vector<8x128xbf16>
    %c2_80 = arith.constant 2 : index
    %c0_81 = arith.constant 0 : index
    %c0_82 = arith.constant 0 : index
    %c0_83 = arith.constant 0 : index
    %135 = vector.load %arg3[%c2_80, %c0_81, %c0_82, %c0_83] : memref<6x3x128x128xbf16, #tpu.memory_space<vmem>>, vector<1x1x128x128xbf16>
    %136 = vector.shape_cast %135 : vector<1x1x128x128xbf16> to vector<128x128xbf16>
    %cst_84 = arith.constant dense<0.000000e+00> : vector<8x128xf32>
    %137 = tpu.matmul %134, %136, %cst_84 {dimension_numbers = #tpu.dot_dimension_numbers<[1], [0], [0], [1], [0, 0, 1, 1], [], []>} : vector<8x128xbf16>, vector<128x128xbf16>, vector<8x128xf32> -> vector<8x128xf32>
    %138 = arith.addf %133, %137 : vector<8x128xf32>
    %139 = arith.truncf %129 : vector<8x128xf32> to vector<8x128xbf16>
    %c2_85 = arith.constant 2 : index
    %c2_86 = arith.constant 2 : index
    %c0_87 = arith.constant 0 : index
    %c0_88 = arith.constant 0 : index
    %140 = vector.load %arg3[%c2_85, %c2_86, %c0_87, %c0_88] : memref<6x3x128x128xbf16, #tpu.memory_space<vmem>>, vector<1x1x128x128xbf16>
    %141 = vector.shape_cast %140 : vector<1x1x128x128xbf16> to vector<128x128xbf16>
    %cst_89 = arith.constant dense<0.000000e+00> : vector<8x128xf32>
    %142 = tpu.matmul %139, %141, %cst_89 {dimension_numbers = #tpu.dot_dimension_numbers<[1], [0], [0], [1], [0, 0, 1, 1], [], []>} : vector<8x128xbf16>, vector<128x128xbf16>, vector<8x128xf32> -> vector<8x128xf32>
    %143 = arith.addf %138, %142 : vector<8x128xf32>
    %c3 = arith.constant 3 : index
    %c0_90 = arith.constant 0 : index
    %c0_91 = arith.constant 0 : index
    %144 = vector.load %arg4[%c3, %c0_90, %c0_91] : memref<7x1x128xf32, #tpu.memory_space<vmem>>, vector<1x1x128xf32>
    %145 = vector.shape_cast %144 : vector<1x1x128xf32> to vector<1x128xf32>
    %146 = vector.broadcast %145 : vector<1x128xf32> to vector<8x128xf32>
    %147 = arith.addf %143, %146 : vector<8x128xf32>
    %cst_92 = arith.constant 0.00999999977 : f32
    %148 = vector.broadcast %cst_92 : f32 to vector<8x128xf32>
    %149 = arith.mulf %148, %147 : vector<8x128xf32>
    %150 = arith.maximumf %147, %149 : vector<8x128xf32>
    %cst_93 = arith.constant 0.000000e+00 : f32
    %151 = vector.broadcast %cst_93 : f32 to vector<1x128xf32>
    %152 = vector.extract_strided_slice %150 {offsets = [0, 0], sizes = [7, 128], strides = [1, 1]} : vector<8x128xf32> to vector<7x128xf32>
    %153 = tpu.concatenate %151, %152 in 0 : vector<1x128xf32>, vector<7x128xf32> -> vector<8x128xf32>
    %154 = tpu.iota {dimensions = array<i32: 0>} : vector<8x128xi32>
    %c3_i32_94 = arith.constant 3 : i32
    %155 = vector.broadcast %c3_i32_94 : i32 to vector<8x128xi32>
    %156 = arith.andi %154, %155 : vector<8x128xi32>
    %c0_i32_95 = arith.constant 0 : i32
    %157 = vector.broadcast %c0_i32_95 : i32 to vector<8x128xi32>
    %158 = arith.cmpi ne, %156, %157 : vector<8x128xi32>
    %cst_96 = arith.constant 0.000000e+00 : f32
    %159 = vector.broadcast %cst_96 : f32 to vector<8x128xf32>
    %160 = arith.select %158, %153, %159 : vector<8x128xi1>, vector<8x128xf32>
    %cst_97 = arith.constant 0.000000e+00 : f32
    %161 = vector.broadcast %cst_97 : f32 to vector<1x128xf32>
    %162 = vector.extract_strided_slice %150 {offsets = [1, 0], sizes = [7, 128], strides = [1, 1]} : vector<8x128xf32> to vector<7x128xf32>
    %163 = tpu.concatenate %162, %161 in 0 : vector<7x128xf32>, vector<1x128xf32> -> vector<8x128xf32>
    %164 = tpu.iota {dimensions = array<i32: 0>} : vector<8x128xi32>
    %c3_i32_98 = arith.constant 3 : i32
    %165 = vector.broadcast %c3_i32_98 : i32 to vector<8x128xi32>
    %166 = arith.andi %164, %165 : vector<8x128xi32>
    %c3_i32_99 = arith.constant 3 : i32
    %167 = vector.broadcast %c3_i32_99 : i32 to vector<8x128xi32>
    %168 = arith.cmpi ne, %166, %167 : vector<8x128xi32>
    %cst_100 = arith.constant 0.000000e+00 : f32
    %169 = vector.broadcast %cst_100 : f32 to vector<8x128xf32>
    %170 = arith.select %168, %163, %169 : vector<8x128xi1>, vector<8x128xf32>
    %171 = arith.truncf %150 : vector<8x128xf32> to vector<8x128xbf16>
    %c3_101 = arith.constant 3 : index
    %c1_102 = arith.constant 1 : index
    %c0_103 = arith.constant 0 : index
    %c0_104 = arith.constant 0 : index
    %172 = vector.load %arg3[%c3_101, %c1_102, %c0_103, %c0_104] : memref<6x3x128x128xbf16, #tpu.memory_space<vmem>>, vector<1x1x128x128xbf16>
    %173 = vector.shape_cast %172 : vector<1x1x128x128xbf16> to vector<128x128xbf16>
    %cst_105 = arith.constant dense<0.000000e+00> : vector<8x128xf32>
    %174 = tpu.matmul %171, %173, %cst_105 {dimension_numbers = #tpu.dot_dimension_numbers<[1], [0], [0], [1], [0, 0, 1, 1], [], []>} : vector<8x128xbf16>, vector<128x128xbf16>, vector<8x128xf32> -> vector<8x128xf32>
    %175 = arith.truncf %160 : vector<8x128xf32> to vector<8x128xbf16>
    %c3_106 = arith.constant 3 : index
    %c0_107 = arith.constant 0 : index
    %c0_108 = arith.constant 0 : index
    %c0_109 = arith.constant 0 : index
    %176 = vector.load %arg3[%c3_106, %c0_107, %c0_108, %c0_109] : memref<6x3x128x128xbf16, #tpu.memory_space<vmem>>, vector<1x1x128x128xbf16>
    %177 = vector.shape_cast %176 : vector<1x1x128x128xbf16> to vector<128x128xbf16>
    %cst_110 = arith.constant dense<0.000000e+00> : vector<8x128xf32>
    %178 = tpu.matmul %175, %177, %cst_110 {dimension_numbers = #tpu.dot_dimension_numbers<[1], [0], [0], [1], [0, 0, 1, 1], [], []>} : vector<8x128xbf16>, vector<128x128xbf16>, vector<8x128xf32> -> vector<8x128xf32>
    %179 = arith.addf %174, %178 : vector<8x128xf32>
    %180 = arith.truncf %170 : vector<8x128xf32> to vector<8x128xbf16>
    %c3_111 = arith.constant 3 : index
    %c2_112 = arith.constant 2 : index
    %c0_113 = arith.constant 0 : index
    %c0_114 = arith.constant 0 : index
    %181 = vector.load %arg3[%c3_111, %c2_112, %c0_113, %c0_114] : memref<6x3x128x128xbf16, #tpu.memory_space<vmem>>, vector<1x1x128x128xbf16>
    %182 = vector.shape_cast %181 : vector<1x1x128x128xbf16> to vector<128x128xbf16>
    %cst_115 = arith.constant dense<0.000000e+00> : vector<8x128xf32>
    %183 = tpu.matmul %180, %182, %cst_115 {dimension_numbers = #tpu.dot_dimension_numbers<[1], [0], [0], [1], [0, 0, 1, 1], [], []>} : vector<8x128xbf16>, vector<128x128xbf16>, vector<8x128xf32> -> vector<8x128xf32>
    %184 = arith.addf %179, %183 : vector<8x128xf32>
    %c4 = arith.constant 4 : index
    %c0_116 = arith.constant 0 : index
    %c0_117 = arith.constant 0 : index
    %185 = vector.load %arg4[%c4, %c0_116, %c0_117] : memref<7x1x128xf32, #tpu.memory_space<vmem>>, vector<1x1x128xf32>
    %186 = vector.shape_cast %185 : vector<1x1x128xf32> to vector<1x128xf32>
    %187 = vector.broadcast %186 : vector<1x128xf32> to vector<8x128xf32>
    %188 = arith.addf %184, %187 : vector<8x128xf32>
    %cst_118 = arith.constant 0.00999999977 : f32
    %189 = vector.broadcast %cst_118 : f32 to vector<8x128xf32>
    %190 = arith.mulf %189, %188 : vector<8x128xf32>
    %191 = arith.maximumf %188, %190 : vector<8x128xf32>
    %cst_119 = arith.constant 0.000000e+00 : f32
    %192 = vector.broadcast %cst_119 : f32 to vector<1x128xf32>
    %193 = vector.extract_strided_slice %191 {offsets = [1, 0], sizes = [7, 128], strides = [1, 1]} : vector<8x128xf32> to vector<7x128xf32>
    %194 = tpu.concatenate %193, %192 in 0 : vector<7x128xf32>, vector<1x128xf32> -> vector<8x128xf32>
    %195 = arith.maximumf %191, %194 : vector<8x128xf32>
    %c0_120 = arith.constant 0 : index
    %c0_121 = arith.constant 0 : index
    %196 = vector.load %arg5[%c0_120, %c0_121] : memref<32x64xf32, #tpu.memory_space<vmem>>, vector<4x8xf32>
    %cst_122 = arith.constant dense<0.000000e+00> : vector<4x128xf32>
    %197 = tpu.matmul %196, %195, %cst_122 {dimension_numbers = #tpu.dot_dimension_numbers<[1], [0], [0], [1], [0, 0, 1, 1], [], []>} : vector<4x8xf32>, vector<8x128xf32>, vector<4x128xf32> -> vector<4x128xf32>
    %cst_123 = arith.constant 0.000000e+00 : f32
    %198 = vector.broadcast %cst_123 : f32 to vector<1x128xf32>
    %199 = vector.extract_strided_slice %197 {offsets = [0, 0], sizes = [3, 128], strides = [1, 1]} : vector<4x128xf32> to vector<3x128xf32>
    %200 = tpu.concatenate %198, %199 in 0 : vector<1x128xf32>, vector<3x128xf32> -> vector<4x128xf32>
    %201 = tpu.iota {dimensions = array<i32: 0>} : vector<4x128xi32>
    %c1_i32 = arith.constant 1 : i32
    %202 = vector.broadcast %c1_i32 : i32 to vector<4x128xi32>
    %203 = arith.andi %201, %202 : vector<4x128xi32>
    %c0_i32_124 = arith.constant 0 : i32
    %204 = vector.broadcast %c0_i32_124 : i32 to vector<4x128xi32>
    %205 = arith.cmpi ne, %203, %204 : vector<4x128xi32>
    %cst_125 = arith.constant 0.000000e+00 : f32
    %206 = vector.broadcast %cst_125 : f32 to vector<4x128xf32>
    %207 = arith.select %205, %200, %206 : vector<4x128xi1>, vector<4x128xf32>
    %cst_126 = arith.constant 0.000000e+00 : f32
    %208 = vector.broadcast %cst_126 : f32 to vector<1x128xf32>
    %209 = vector.extract_strided_slice %197 {offsets = [1, 0], sizes = [3, 128], strides = [1, 1]} : vector<4x128xf32> to vector<3x128xf32>
    %210 = tpu.concatenate %209, %208 in 0 : vector<3x128xf32>, vector<1x128xf32> -> vector<4x128xf32>
    %211 = tpu.iota {dimensions = array<i32: 0>} : vector<4x128xi32>
    %c1_i32_127 = arith.constant 1 : i32
    %212 = vector.broadcast %c1_i32_127 : i32 to vector<4x128xi32>
    %213 = arith.andi %211, %212 : vector<4x128xi32>
    %c1_i32_128 = arith.constant 1 : i32
    %214 = vector.broadcast %c1_i32_128 : i32 to vector<4x128xi32>
    %215 = arith.cmpi ne, %213, %214 : vector<4x128xi32>
    %cst_129 = arith.constant 0.000000e+00 : f32
    %216 = vector.broadcast %cst_129 : f32 to vector<4x128xf32>
    %217 = arith.select %215, %210, %216 : vector<4x128xi1>, vector<4x128xf32>
    %218 = arith.truncf %197 : vector<4x128xf32> to vector<4x128xbf16>
    %c4_130 = arith.constant 4 : index
    %c1_131 = arith.constant 1 : index
    %c0_132 = arith.constant 0 : index
    %c0_133 = arith.constant 0 : index
    %219 = vector.load %arg3[%c4_130, %c1_131, %c0_132, %c0_133] : memref<6x3x128x128xbf16, #tpu.memory_space<vmem>>, vector<1x1x128x128xbf16>
    %220 = vector.shape_cast %219 : vector<1x1x128x128xbf16> to vector<128x128xbf16>
    %cst_134 = arith.constant dense<0.000000e+00> : vector<4x128xf32>
    %221 = tpu.matmul %218, %220, %cst_134 {dimension_numbers = #tpu.dot_dimension_numbers<[1], [0], [0], [1], [0, 0, 1, 1], [], []>} : vector<4x128xbf16>, vector<128x128xbf16>, vector<4x128xf32> -> vector<4x128xf32>
    %222 = arith.truncf %207 : vector<4x128xf32> to vector<4x128xbf16>
    %c4_135 = arith.constant 4 : index
    %c0_136 = arith.constant 0 : index
    %c0_137 = arith.constant 0 : index
    %c0_138 = arith.constant 0 : index
    %223 = vector.load %arg3[%c4_135, %c0_136, %c0_137, %c0_138] : memref<6x3x128x128xbf16, #tpu.memory_space<vmem>>, vector<1x1x128x128xbf16>
    %224 = vector.shape_cast %223 : vector<1x1x128x128xbf16> to vector<128x128xbf16>
    %cst_139 = arith.constant dense<0.000000e+00> : vector<4x128xf32>
    %225 = tpu.matmul %222, %224, %cst_139 {dimension_numbers = #tpu.dot_dimension_numbers<[1], [0], [0], [1], [0, 0, 1, 1], [], []>} : vector<4x128xbf16>, vector<128x128xbf16>, vector<4x128xf32> -> vector<4x128xf32>
    %226 = arith.addf %221, %225 : vector<4x128xf32>
    %227 = arith.truncf %217 : vector<4x128xf32> to vector<4x128xbf16>
    %c4_140 = arith.constant 4 : index
    %c2_141 = arith.constant 2 : index
    %c0_142 = arith.constant 0 : index
    %c0_143 = arith.constant 0 : index
    %228 = vector.load %arg3[%c4_140, %c2_141, %c0_142, %c0_143] : memref<6x3x128x128xbf16, #tpu.memory_space<vmem>>, vector<1x1x128x128xbf16>
    %229 = vector.shape_cast %228 : vector<1x1x128x128xbf16> to vector<128x128xbf16>
    %cst_144 = arith.constant dense<0.000000e+00> : vector<4x128xf32>
    %230 = tpu.matmul %227, %229, %cst_144 {dimension_numbers = #tpu.dot_dimension_numbers<[1], [0], [0], [1], [0, 0, 1, 1], [], []>} : vector<4x128xbf16>, vector<128x128xbf16>, vector<4x128xf32> -> vector<4x128xf32>
    %231 = arith.addf %226, %230 : vector<4x128xf32>
    %c5 = arith.constant 5 : index
    %c0_145 = arith.constant 0 : index
    %c0_146 = arith.constant 0 : index
    %232 = vector.load %arg4[%c5, %c0_145, %c0_146] : memref<7x1x128xf32, #tpu.memory_space<vmem>>, vector<1x1x128xf32>
    %233 = vector.shape_cast %232 : vector<1x1x128xf32> to vector<1x128xf32>
    %234 = vector.broadcast %233 : vector<1x128xf32> to vector<4x128xf32>
    %235 = arith.addf %231, %234 : vector<4x128xf32>
    %cst_147 = arith.constant 0.00999999977 : f32
    %236 = vector.broadcast %cst_147 : f32 to vector<4x128xf32>
    %237 = arith.mulf %236, %235 : vector<4x128xf32>
    %238 = arith.maximumf %235, %237 : vector<4x128xf32>
    %cst_148 = arith.constant 0.000000e+00 : f32
    %239 = vector.broadcast %cst_148 : f32 to vector<1x128xf32>
    %240 = vector.extract_strided_slice %238 {offsets = [0, 0], sizes = [3, 128], strides = [1, 1]} : vector<4x128xf32> to vector<3x128xf32>
    %241 = tpu.concatenate %239, %240 in 0 : vector<1x128xf32>, vector<3x128xf32> -> vector<4x128xf32>
    %242 = tpu.iota {dimensions = array<i32: 0>} : vector<4x128xi32>
    %c1_i32_149 = arith.constant 1 : i32
    %243 = vector.broadcast %c1_i32_149 : i32 to vector<4x128xi32>
    %244 = arith.andi %242, %243 : vector<4x128xi32>
    %c0_i32_150 = arith.constant 0 : i32
    %245 = vector.broadcast %c0_i32_150 : i32 to vector<4x128xi32>
    %246 = arith.cmpi ne, %244, %245 : vector<4x128xi32>
    %cst_151 = arith.constant 0.000000e+00 : f32
    %247 = vector.broadcast %cst_151 : f32 to vector<4x128xf32>
    %248 = arith.select %246, %241, %247 : vector<4x128xi1>, vector<4x128xf32>
    %cst_152 = arith.constant 0.000000e+00 : f32
    %249 = vector.broadcast %cst_152 : f32 to vector<1x128xf32>
    %250 = vector.extract_strided_slice %238 {offsets = [1, 0], sizes = [3, 128], strides = [1, 1]} : vector<4x128xf32> to vector<3x128xf32>
    %251 = tpu.concatenate %250, %249 in 0 : vector<3x128xf32>, vector<1x128xf32> -> vector<4x128xf32>
    %252 = tpu.iota {dimensions = array<i32: 0>} : vector<4x128xi32>
    %c1_i32_153 = arith.constant 1 : i32
    %253 = vector.broadcast %c1_i32_153 : i32 to vector<4x128xi32>
    %254 = arith.andi %252, %253 : vector<4x128xi32>
    %c1_i32_154 = arith.constant 1 : i32
    %255 = vector.broadcast %c1_i32_154 : i32 to vector<4x128xi32>
    %256 = arith.cmpi ne, %254, %255 : vector<4x128xi32>
    %cst_155 = arith.constant 0.000000e+00 : f32
    %257 = vector.broadcast %cst_155 : f32 to vector<4x128xf32>
    %258 = arith.select %256, %251, %257 : vector<4x128xi1>, vector<4x128xf32>
    %259 = arith.truncf %238 : vector<4x128xf32> to vector<4x128xbf16>
    %c5_156 = arith.constant 5 : index
    %c1_157 = arith.constant 1 : index
    %c0_158 = arith.constant 0 : index
    %c0_159 = arith.constant 0 : index
    %260 = vector.load %arg3[%c5_156, %c1_157, %c0_158, %c0_159] : memref<6x3x128x128xbf16, #tpu.memory_space<vmem>>, vector<1x1x128x128xbf16>
    %261 = vector.shape_cast %260 : vector<1x1x128x128xbf16> to vector<128x128xbf16>
    %cst_160 = arith.constant dense<0.000000e+00> : vector<4x128xf32>
    %262 = tpu.matmul %259, %261, %cst_160 {dimension_numbers = #tpu.dot_dimension_numbers<[1], [0], [0], [1], [0, 0, 1, 1], [], []>} : vector<4x128xbf16>, vector<128x128xbf16>, vector<4x128xf32> -> vector<4x128xf32>
    %263 = arith.truncf %248 : vector<4x128xf32> to vector<4x128xbf16>
    %c5_161 = arith.constant 5 : index
    %c0_162 = arith.constant 0 : index
    %c0_163 = arith.constant 0 : index
    %c0_164 = arith.constant 0 : index
    %264 = vector.load %arg3[%c5_161, %c0_162, %c0_163, %c0_164] : memref<6x3x128x128xbf16, #tpu.memory_space<vmem>>, vector<1x1x128x128xbf16>
    %265 = vector.shape_cast %264 : vector<1x1x128x128xbf16> to vector<128x128xbf16>
    %cst_165 = arith.constant dense<0.000000e+00> : vector<4x128xf32>
    %266 = tpu.matmul %263, %265, %cst_165 {dimension_numbers = #tpu.dot_dimension_numbers<[1], [0], [0], [1], [0, 0, 1, 1], [], []>} : vector<4x128xbf16>, vector<128x128xbf16>, vector<4x128xf32> -> vector<4x128xf32>
    %267 = arith.addf %262, %266 : vector<4x128xf32>
    %268 = arith.truncf %258 : vector<4x128xf32> to vector<4x128xbf16>
    %c5_166 = arith.constant 5 : index
    %c2_167 = arith.constant 2 : index
    %c0_168 = arith.constant 0 : index
    %c0_169 = arith.constant 0 : index
    %269 = vector.load %arg3[%c5_166, %c2_167, %c0_168, %c0_169] : memref<6x3x128x128xbf16, #tpu.memory_space<vmem>>, vector<1x1x128x128xbf16>
    %270 = vector.shape_cast %269 : vector<1x1x128x128xbf16> to vector<128x128xbf16>
    %cst_170 = arith.constant dense<0.000000e+00> : vector<4x128xf32>
    %271 = tpu.matmul %268, %270, %cst_170 {dimension_numbers = #tpu.dot_dimension_numbers<[1], [0], [0], [1], [0, 0, 1, 1], [], []>} : vector<4x128xbf16>, vector<128x128xbf16>, vector<4x128xf32> -> vector<4x128xf32>
    %272 = arith.addf %267, %271 : vector<4x128xf32>
    %c6 = arith.constant 6 : index
    %c0_171 = arith.constant 0 : index
    %c0_172 = arith.constant 0 : index
    %273 = vector.load %arg4[%c6, %c0_171, %c0_172] : memref<7x1x128xf32, #tpu.memory_space<vmem>>, vector<1x1x128xf32>
    %274 = vector.shape_cast %273 : vector<1x1x128xf32> to vector<1x128xf32>
    %275 = vector.broadcast %274 : vector<1x128xf32> to vector<4x128xf32>
    %276 = arith.addf %272, %275 : vector<4x128xf32>
    %cst_173 = arith.constant 0.00999999977 : f32
    %277 = vector.broadcast %cst_173 : f32 to vector<4x128xf32>
    %278 = arith.mulf %277, %276 : vector<4x128xf32>
    %279 = arith.maximumf %276, %278 : vector<4x128xf32>
    %cst_174 = arith.constant 0.000000e+00 : f32
    %280 = vector.broadcast %cst_174 : f32 to vector<1x128xf32>
    %281 = vector.extract_strided_slice %279 {offsets = [1, 0], sizes = [3, 128], strides = [1, 1]} : vector<4x128xf32> to vector<3x128xf32>
    %282 = tpu.concatenate %281, %280 in 0 : vector<3x128xf32>, vector<1x128xf32> -> vector<4x128xf32>
    %283 = arith.maximumf %279, %282 : vector<4x128xf32>
    %c0_175 = arith.constant 0 : index
    %c0_176 = arith.constant 0 : index
    %284 = vector.load %arg5[%c0_175, %c0_176] : memref<32x64xf32, #tpu.memory_space<vmem>>, vector<2x4xf32>
    %cst_177 = arith.constant dense<0.000000e+00> : vector<2x128xf32>
    %285 = tpu.matmul %284, %283, %cst_177 {dimension_numbers = #tpu.dot_dimension_numbers<[1], [0], [0], [1], [0, 0, 1, 1], [], []>} : vector<2x4xf32>, vector<4x128xf32>, vector<2x128xf32> -> vector<2x128xf32>
    %286 = arith.truncf %285 : vector<2x128xf32> to vector<2x128xbf16>
    %c0_178 = arith.constant 0 : index
    %c0_179 = arith.constant 0 : index
    %287 = vector.load %arg6[%c0_178, %c0_179] : memref<128x128xbf16, #tpu.memory_space<vmem>>, vector<128x128xbf16>
    %cst_180 = arith.constant dense<0.000000e+00> : vector<2x128xf32>
    %288 = tpu.matmul %286, %287, %cst_180 {dimension_numbers = #tpu.dot_dimension_numbers<[1], [0], [0], [1], [0, 0, 1, 1], [], []>} : vector<2x128xbf16>, vector<128x128xbf16>, vector<2x128xf32> -> vector<2x128xf32>
    %c0_181 = arith.constant 0 : index
    %c0_182 = arith.constant 0 : index
    %289 = vector.load %arg7[%c0_181, %c0_182] : memref<1x128xf32, #tpu.memory_space<vmem>>, vector<1x128xf32>
    %290 = vector.broadcast %289 : vector<1x128xf32> to vector<2x128xf32>
    %291 = arith.addf %288, %290 : vector<2x128xf32>
    %cst_183 = arith.constant 0.00999999977 : f32
    %292 = vector.broadcast %cst_183 : f32 to vector<2x128xf32>
    %293 = arith.mulf %292, %291 : vector<2x128xf32>
    %294 = arith.maximumf %291, %293 : vector<2x128xf32>
    %c0_184 = arith.constant 0 : index
    %c0_185 = arith.constant 0 : index
    %295 = vector.load %arg8[%c0_184, %c0_185] : memref<1x128xf32, #tpu.memory_space<vmem>>, vector<1x128xf32>
    %296 = vector.broadcast %295 : vector<1x128xf32> to vector<2x128xf32>
    %297 = arith.mulf %294, %296 : vector<2x128xf32>
    %cst_186 = arith.constant dense<0.000000e+00> : vector<2xf32>
    %298 = vector.multi_reduction <add>, %297, %cst_186 [1] : vector<2x128xf32> to vector<2xf32>
    %299 = vector.shape_cast %298 : vector<2xf32> to vector<2x1xf32>
    %c0_187 = arith.constant 0 : index
    %c0_188 = arith.constant 0 : index
    %300 = vector.load %arg9[%c0_187, %c0_188] : memref<1x1xf32, #tpu.memory_space<vmem>>, vector<1x1xf32>
    %301 = vector.broadcast %300 : vector<1x1xf32> to vector<2x1xf32>
    %302 = arith.addf %299, %301 : vector<2x1xf32>
    %c0_189 = arith.constant 0 : index
    %c0_190 = arith.constant 0 : index
    %c0_191 = arith.constant 0 : index
    %303 = vector.load %arg10[%c0_189, %c0_190, %c0_191] : memref<1x2x1xf32, #tpu.memory_space<vmem>>, vector<1x2x1xf32>
    %304 = vector.shape_cast %303 : vector<1x2x1xf32> to vector<2x1xf32>
    %305 = vector.shape_cast %302 : vector<2x1xf32> to vector<1x2x1xf32>
    tpu.vector_store %arg10[%c0_189, %c0_190, %c0_191], %305 {strides = array<i32>} : memref<1x2x1xf32, #tpu.memory_space<vmem>>, vector<1x2x1xf32>,
    return
  }
  func.func @transform_0(%arg0: i32) -> (i32, i32) {
    %c0_i32 = arith.constant 0 : i32
    %c0_i32_0 = arith.constant 0 : i32
    return %arg0, %c0_i32 : i32, i32
  }
  func.func @transform_1(%arg0: i32) -> (i32, i32) {
    %c0_i32 = arith.constant 0 : i32
    %c0_i32_0 = arith.constant 0 : i32
    %c0_i32_1 = arith.constant 0 : i32
    return %c0_i32, %c0_i32_0 : i32, i32
  }
  func.func @transform_2(%arg0: i32) -> (i32, i32, i32, i32) {
    %c0_i32 = arith.constant 0 : i32
    %c0_i32_0 = arith.constant 0 : i32
    %c0_i32_1 = arith.constant 0 : i32
    %c0_i32_2 = arith.constant 0 : i32
    %c0_i32_3 = arith.constant 0 : i32
    return %c0_i32, %c0_i32_0, %c0_i32_1, %c0_i32_2 : i32, i32, i32, i32
  }
  func.func @transform_3(%arg0: i32) -> (i32, i32, i32) {
    %c0_i32 = arith.constant 0 : i32
    %c0_i32_0 = arith.constant 0 : i32
    %c0_i32_1 = arith.constant 0 : i32
    %c0_i32_2 = arith.constant 0 : i32
    return %c0_i32, %c0_i32_0, %c0_i32_1 : i32, i32, i32
  }
  func.func @transform_4(%arg0: i32) -> (i32, i32) {
    %c0_i32 = arith.constant 0 : i32
    %c0_i32_0 = arith.constant 0 : i32
    %c0_i32_1 = arith.constant 0 : i32
    return %c0_i32, %c0_i32_0 : i32, i32
  }
  func.func @transform_5(%arg0: i32) -> (i32, i32) {
    %c0_i32 = arith.constant 0 : i32
    %c0_i32_0 = arith.constant 0 : i32
    %c0_i32_1 = arith.constant 0 : i32
    return %c0_i32, %c0_i32_0 : i32, i32
  }
  func.func @transform_6(%arg0: i32) -> (i32, i32) {
    %c0_i32 = arith.constant 0 : i32
    %c0_i32_0 = arith.constant 0 : i32
    %c0_i32_1 = arith.constant 0 : i32
    return %c0_i32, %c0_i32_0 : i32, i32
  }
  func.func @transform_7(%arg0: i32) -> (i32, i32) {
    %c0_i32 = arith.constant 0 : i32
    %c0_i32_0 = arith.constant 0 : i32
    %c0_i32_1 = arith.constant 0 : i32
    return %c0_i32, %c0_i32_0 : i32, i32
  }
  func.func @transform_8(%arg0: i32) -> (i32, i32) {
    %c0_i32 = arith.constant 0 : i32
    %c0_i32_0 = arith.constant 0 : i32
    %c0_i32_1 = arith.constant 0 : i32
    return %c0_i32, %c0_i32_0 : i32, i32
  }
  func.func @transform_9(%arg0: i32) -> (i32, i32, i32) {
    %c0_i32 = arith.constant 0 : i32
    %c0_i32_0 = arith.constant 0 : i32
    %c0_i32_1 = arith.constant 0 : i32
    return %arg0, %c0_i32, %c0_i32_0 : i32, i32, i32
  }
}

</mosaic_0001>

<bundles_post_ra>
// kernel: cnn7_forward.1
= control target key start
LH: loop header
LB: loop body
LE: loop exit
PB: predicated region body
PF: predicated region fallthrough
CT: control target
= control target key end

     0   :  { %vm264_vm0 = vcmask 523264   ;;  %vm227_vm1 = vcmask 1046528   ;;  %vm366_vm2 = vcmask 1040384   ;;  %vm4341_vm4 = vmmov 1   ;;  %s5245_s1 = inlined_call_operand.vmem [shape: bf16[128,128], index: 1, kind: input, shape index: {}]   ;;  %s5246_s0 = inlined_call_operand.vmem [shape: bf16[64,128], index: 0, kind: input, shape index: {}]   ;;  %s5247_s4 = inlined_call_operand.vmem [shape: f32[32,64], index: 4, kind: input, shape index: {}]   ;;  %s5248_s2 = inlined_call_operand.vmem [shape: bf16[6,3,128,128], index: 2, kind: input, shape index: {}]   ;;  %s5249_s3 = inlined_call_operand.vmem [shape: f32[7,1,128], index: 3, kind: input, shape index: {}]   ;;  %s5250_s5 = inlined_call_operand.vmem [shape: bf16[128,128], index: 5, kind: input, shape index: {}]   ;;  %s5251_s8 = inlined_call_operand.<no memory space> [shape: f32[1,1], index: 8, kind: input, shape index: {}]   ;;  %s5252_s6 = inlined_call_operand.vmem [shape: f32[1,128], index: 6, kind: input, shape index: {}]   ;;  %s5253_s7 = inlined_call_operand.vmem [shape: f32[1,128], index: 7, kind: input, shape index: {}]   ;;  %s5254_s9 = inlined_call_operand.vmem [shape: f32[1,2,1], index: 9, kind: output, shape index: {}]  }
   0x1   :  { %v4176_v0 = vld [vmem:[%s5245_s1 + $0x38] sm:$0xff]   ;;  %v4177_v1 = vld [vmem:[%s5245_s1 + $0x30] sm:$0xff]   ;;  %v4178_v2 = vld [vmem:[%s5245_s1 + $0x28] sm:$0xff]   ;;  %vm809_vm12 = vcmask 261120   ;;  %vm4343_vm13 = vmmov 0  }
   0x2   :  { %3719 = vmatprep.subr.bf16.mxu0 %v4176_v0  ;;  %v4179_v3 = vld [vmem:[%s5245_s1 + $0x20] sm:$0xff]   ;;  %v4180_v5 = vld [vmem:[%s5245_s1 + $0x18] sm:$0xff]   ;;  %v4181_v6 = vld [vmem:[%s5245_s1 + $0x10] sm:$0xff]  }
   0x3   :  { %3720 = vmatpush3.bf16.msra.mxu0 %v4176_v0  ;;  %v4184_v4 = vld [vmem:[%s5246_s0] sm:$0xff]   ;;  %v4182_v7 = vld [vmem:[%s5245_s1 + $0x8] sm:$0xff]   ;;  %v4186_v10 = vld [vmem:[%s5246_s0 + $0x10] sm:$0xff]  }
   0x4   :  { %3721 = vmatprep.subr.bf16.mxu0 %v4177_v1  ;;  %3735 = vmatprep.mubr.bf16.mxu0 %v4184_v4  ;;  %v4183_v8 = vld [vmem:[%s5245_s1] sm:$0xff]   ;;  %v4185_v9 = vld [vmem:[%s5246_s0 + $0x8] sm:$0xff]   ;;  %v4187_v11 = vld [vmem:[%s5246_s0 + $0x18] sm:$0xff]  }
   0x5   :  { %v4433_v12 = vld [vmem:[%s5247_s4] sm:$0xff]  ;;  %v4188_v13 = vld [vmem:[%s5248_s2 + $0x78] sm:$0xff]   ;;  %v4190_v14 = vld [vmem:[%s5248_s2 + $0x70] sm:$0xff]  }
   0x6   :  { %3759 = vmatprep.mubr.msk.f32.mxu1 %vm264_vm0, %v4433_v12  ;;  %v4192_v15 = vld [vmem:[%s5248_s2 + $0x68] sm:$0xff]   ;;  %v4194_v16 = vld [vmem:[%s5248_s2 + $0x60] sm:$0xff]   ;;  %v4196_v17 = vld [vmem:[%s5248_s2 + $0x58] sm:$0xff]  }
   0x7   :  { %3722 = vmatpush3.bf16.msra.mxu0 %v4177_v1  ;;  %v4198_v18 = vld [vmem:[%s5248_s2 + $0x50] sm:$0xff]   ;;  %v3004_v22 = vld [vmem:[%s5249_s3] ss:$0 sm:$0xff] }
   0x8   :  { %3723 = vmatprep.subr.bf16.mxu0 %v4178_v2 }
   0xb   :  { %3724 = vmatpush3.bf16.msra.mxu0 %v4178_v2 }
   0xc   :  { %3725 = vmatprep.subr.bf16.mxu0 %v4179_v3 }
   0xf   :  { %3726 = vmatpush3.bf16.msra.mxu0 %v4179_v3 }
  0x10   :  { %3727 = vmatprep.subr.bf16.mxu0 %v4180_v5 }
  0x13   :  { %3728 = vmatpush3.bf16.msra.mxu0 %v4180_v5 }
  0x14   :  { %3729 = vmatprep.subr.bf16.mxu0 %v4181_v6 }
  0x17   :  { %3730 = vmatpush3.bf16.msra.mxu0 %v4181_v6 }
  0x18   :  { %3731 = vmatprep.subr.bf16.mxu0 %v4182_v7 }
  0x1b   :  { %3732 = vmatpush3.bf16.msra.mxu0 %v4182_v7 }
  0x1c   :  { %3733 = vmatprep.subr.bf16.mxu0 %v4183_v8 }
  0x1f   :  { %3734 = vmatpush3.bf16.msra.mxu0 %v4183_v8 }
  0x20   :  { %3785 = vmatprep.subr.bf16.mxu0 %v4188_v13 }
  0x22   :  { %3736 = vmatmul.mubr.bf16.vlgmr.msra.gmra.mxu0 %v4185_v9 }
  0x23   :  { %3739 = vmatprep.mubr.bf16.mxu0 %v4186_v10  ;;  %3786 = vmatpush3.bf16.msra.mxu0 %v4188_v13  ;;  %v4189_v13 = vld [vmem:[%s5248_s2 + $0x38] sm:$0xff]  }
  0x24   :  { %3787 = vmatprep.subr.bf16.mxu0 %v4190_v14 }
  0x27   :  { %3788 = vmatpush3.bf16.msra.mxu0 %v4190_v14  ;;  %v4472_v14 = vld [vmem:[%s5247_s4 + $0x8] sm:$0xff] }
  0x28   :  { %3789 = vmatprep.subr.bf16.mxu0 %v4192_v15 }
  0x2a   :  { %3740 = vmatmul.mubr.bf16.gmra.mxu0 %v4187_v11 }
  0x2b   :  { %3790 = vmatpush3.bf16.msra.mxu0 %v4192_v15  ;;  %v262_v15 = vld [vmem:[%s5247_s4 + $0x10] sm:$0xff] }
  0x2c   :  { %3791 = vmatprep.subr.bf16.mxu0 %v4194_v16 }
  0x2f   :  { %3792 = vmatpush3.bf16.msra.mxu0 %v4194_v16  ;;  %v4191_v16 = vld [vmem:[%s5248_s2 + $0x30] sm:$0xff]  }
  0x30   :  { %3793 = vmatprep.subr.bf16.mxu0 %v4196_v17 }
  0x33   :  { %3794 = vmatpush3.bf16.msra.mxu0 %v4196_v17  ;;  %v263_v17 = vld [vmem:[%s5247_s4 + $0x18] sm:$0xff] }
  0x34   :  { %3795 = vmatprep.subr.bf16.mxu0 %v4198_v18 }
  0x37   :  { %3796 = vmatpush3.bf16.msra.mxu0 %v4198_v18  ;;  %v4193_v18 = vld [vmem:[%s5248_s2 + $0x28] sm:$0xff]  }
  0xe2   :  { %v3737_v19 = vpop.f32.mrf.mxu0 }
  0xe3   :  { %v181_v25 = vadd.f32 %v3737_v19, %v3004_v22  ;;  %v4195_v19 = vld [vmem:[%s5248_s2 + $0x20] sm:$0xff]  }
  0xe4   :  { %v172_v20 = vpop.f32.mrf.mxu0 }
  0xe5   :  { %v205_v32 = vmul.f32 0.01, %v181_v25  ;;  %v173_v44 = vadd.f32 %v3004_v22, %v172_v20  ;;  %v4197_v20 = vld [vmem:[%s5248_s2 + $0x18] sm:$0xff]  }
  0xe6   :  { %v3738_v21 = vpop.f32.mrf.mxu0 }
  0xe7   :  { %v184_v26 = vadd.f32 %v3738_v21, %v3004_v22  ;;  %v213_v53 = vmax.f32 %v181_v25, %v205_v32  ;;  %v203_v55 = vmul.f32 0.01, %v173_v44  ;;  %v4199_v21 = vld [vmem:[%s5248_s2 + $0x10] sm:$0xff]   ;;  %v4203_v25 = vld [vmem:[%s5248_s2] sm:$0xff]  }
  0xe8   :  { %v175_v23 = vpop.f32.mrf.mxu0 }
  0xe9   :  { %v206_v33 = vmul.f32 0.01, %v184_v26  ;;  %v176_v34 = vadd.f32 %v3004_v22, %v175_v23  ;;  %v231_v63 = vrot.slane %v213_v53, 1  ;;  %v211_v0 = vmax.f32 %v173_v44, %v203_v55  ;;  %v4201_v23 = vld [vmem:[%s5248_s2 + $0x8] sm:$0xff]  }
  0xea   :  { %v3741_v24 = vpop.f32.mrf.mxu0 }
  0xeb   :  { %v197_v27 = vadd.f32 %v3741_v24, %v3004_v22  ;;  %v204_v41 = vmul.f32 0.01, %v176_v34  ;;  %v214_v49 = vmax.f32 %v184_v26, %v206_v33  ;;  %v228_v6 = vrot.slane %v211_v0, 1  ;;  %v4202_v24 = vld [vmem:[%s5248_s2 + $0x40] sm:$0xff]   ;;  %v4204_v26 = vld [vmem:[%s5248_s2 + $0xb8] sm:$0xff]  }
  0xec   :  { %v188_v28 = vpop.f32.mrf.mxu0 }
  0xed   :  { %v209_v29 = vmul.f32 0.01, %v197_v27  ;;  %v189_v30 = vadd.f32 %v3004_v22, %v188_v28  ;;  %v212_v56 = vmax.f32 %v176_v34, %v204_v41  ;;  %v233_v60 = vrot.slane %v214_v49, 1 }
  0xee   :  { %v3742_v31 = vpop.f32.mrf.mxu0 }
  0xef   :  { %v200_v35 = vadd.f32 %v3742_v31, %v3004_v22  ;;  %v217_v37 = vmax.f32 %v197_v27, %v209_v29  ;;  %v207_v38 = vmul.f32 0.01, %v189_v30  ;;  %v229_v1 = vrot.slane %v212_v56, 1 }
  0xf0   :  { %v191_v36 = vpop.f32.mrf.mxu0  ;;  %v234_v4 = vsel %vm227_vm1, %v231_v63, %v233_v60  ;;  %v379_v27 = vlaneseq }
  0xf1   :  { %v210_v39 = vmul.f32 0.01, %v200_v35  ;;  %v192_v40 = vadd.f32 %v3004_v22, %v191_v36  ;;  %v239_v45 = vrot.slane %v217_v37, 1  ;;  %v215_v46 = vmax.f32 %v189_v30, %v207_v38  ;;  %v4200_v22 = vld [vmem:[%s5248_s2 + $0x48] sm:$0xff]  }
  0xf2   :  { %v232_v7 = vsel %vm227_vm1, %v229_v1, %v231_v63  ;;  %v254_v8 = vmax.f32 %v213_v53, %v234_v4  ;;  %v230_v9 = vsel %vm227_vm1, %v228_v6, %v229_v1  ;;  %3797 = vmatprep.subr.bf16.mxu0 %v4200_v22  ;;  %v4514_v28 = vshrl.u32 %v379_v27, 7  ;;  %v4211_v63 = vld [vmem:[%s5248_s2 + $0x80] sm:$0xff]   ;;  %v4213_v6 = vld [vmem:[%s5248_s2 + $0xf8] sm:$0xff]  }
  0xf3   :  { %v218_v42 = vmax.f32 %v200_v35, %v210_v39  ;;  %v208_v43 = vmul.f32 0.01, %v192_v40  ;;  %v235_v57 = vrot.slane %v215_v46, 1  ;;  %v253_v10 = vmax.f32 %v212_v56, %v232_v7  ;;  %3798 = vmatpush3.bf16.msra.mxu0 %v4200_v22  ;;  %v4205_v56 = vld [vmem:[%s5248_s2 + $0xb0] sm:$0xff]   ;;  %v3090_v22 = vld [vmem:[%s5249_s3 + $0x1] ss:$0 sm:$0xff] }
  0xf4   :  { %v252_v11 = vmax.f32 %v211_v0, %v230_v9  ;;  %3799 = vmatprep.subr.bf16.mxu0 %v4202_v24  ;;  %v384_v29 = vand.u32 15, %v4514_v28  ;;  %v382_v30 = vadd.s32 16, %v4514_v28  ;;  %v4519_v31 = vadd.s32 8, %v4514_v28  ;;  %v4215_v7 = vld [vmem:[%s5248_s2 + $0xf0] sm:$0xff]   ;;  %v4221_v9 = vld [vmem:[%s5248_s2 + $0xd8] sm:$0xff]  }
  0xf5   :  { %v216_v47 = vmax.f32 %v192_v40, %v208_v43  ;;  %v241_v48 = vrot.slane %v218_v42, 1  ;;  %v236_v2 = vsel %vm227_vm1, %v233_v60, %v235_v57  ;;  %v4209_v60 = vld [vmem:[%s5248_s2 + $0x90] sm:$0xff]  }
  0xf6   :  { %v255_v5 = vmax.f32 %v214_v49, %v236_v2  ;;  %vm388_vm3 = vcmp.ne.s32.totalorder %v384_v29, 0  ;;  %v386_v34 = vand.u32 15, %v382_v30  ;;  %v385_v35 = vand.u32 15, %v4519_v31 }
  0xf7   :  { %v237_v50 = vrot.slane %v216_v47, 1  ;;  %v251_v51 = vsel %vm227_vm1, %v241_v48, 0.0  ;;  %v242_v52 = vsel %vm227_vm1, %v239_v45, %v241_v48  ;;  %3800 = vmatpush3.bf16.msra.mxu0 %v4202_v24  ;;  %vm3045_vm5 = vmpackc.low %vm4341_vm4, %vm388_vm3 }
  0xf8   :  { %v259_v54 = vmax.f32 %v218_v42, %v251_v51  ;;  %v258_v59 = vmax.f32 %v217_v37, %v242_v52  ;;  %vm390_vm6 = vcmp.ne.s32.totalorder %v386_v34, 0  ;;  %vm409_vm7 = vcmp.ne.s32.totalorder %v385_v35, 15 }
  0xf9   :  { %v240_v58 = vsel %vm227_vm1, %v237_v50, %v239_v45  ;;  %v238_v61 = vsel %vm227_vm1, %v235_v57, %v237_v50  ;;  %vm3048_vm8 = vmpackc.low %vm4341_vm4, %vm390_vm6  ;;  %v4206_v57 = vld [vmem:[%s5248_s2 + $0xa8] sm:$0xff]   ;;  %vm1263_vm6 = vcmask 130048  }
  0xfa   :  { %3743 = vmatprep.subr.mxu1 %v259_v54  ;;  %v257_v62 = vmax.f32 %v216_v47, %v240_v58  ;;  %v256_v3 = vmax.f32 %v215_v46, %v238_v61  ;;  %vm3083_vm9 = vmpackc.low %vm409_vm7, %vm4341_vm4  ;;  %v4207_v58 = vld [vmem:[%s5248_s2 + $0xa0] sm:$0xff]   ;;  %v4210_v61 = vld [vmem:[%s5248_s2 + $0x88] sm:$0xff]  }
  0xfb   :  { %3744 = vmatpush3.msra.mxu1 %v259_v54 }
  0xfc   :  { %3745 = vmatprep.subr.mxu1 %v258_v59 }
  0xfd   :  { %3746 = vmatpush3.msra.mxu1 %v258_v59  ;;  %v4208_v59 = vld [vmem:[%s5248_s2 + $0x98] sm:$0xff]  }
  0xfe   :  { %3747 = vmatprep.subr.mxu1 %v257_v62 }
  0xff   :  { %3748 = vmatpush3.msra.mxu1 %v257_v62  ;;  %v383_v62 = vadd.s32 24, %v4514_v28 }
 0x100   :  { %3749 = vmatprep.subr.mxu1 %v256_v3 }
 0x101   :  { %3750 = vmatpush3.msra.mxu1 %v256_v3  ;;  %v387_v0 = vand.u32 15, %v383_v62  ;;  %v4216_v62 = vld [vmem:[%s5248_s2 + $0x128] sm:$0xff]  }
 0x102   :  { %3751 = vmatprep.subr.mxu1 %v255_v5 }
 0x103   :  { %3752 = vmatpush3.msra.mxu1 %v255_v5  ;;  %vm411_vm10 = vcmp.ne.s32.totalorder %v387_v0, 15  ;;  %v4342_v5 = vmov 0.0   ;;  %v4222_v0 = vld [vmem:[%s5248_s2 + $0x110] sm:$0xff]  }
 0x104   :  { %3753 = vmatprep.subr.mxu1 %v254_v8  ;;  %vm3086_vm11 = vmpackc.low %vm411_vm10, %vm4341_vm4  ;;  %3836 = vmatprep.subr.bf16.mxu0 %v4342_v5 }
 0x105   :  { %3754 = vmatpush3.msra.mxu1 %v254_v8  ;;  %v4219_v8 = vld [vmem:[%s5248_s2 + $0xe0] sm:$0xff]  }
 0x106   :  { %3755 = vmatprep.subr.mxu1 %v253_v10 }
 0x107   :  { %3756 = vmatpush3.msra.mxu1 %v253_v10  ;;  %v4223_v10 = vld [vmem:[%s5248_s2 + $0xd0] sm:$0xff]  }
 0x108   :  { %3757 = vmatprep.subr.mxu1 %v252_v11 }
 0x109   :  { %3758 = vmatpush3.msra.mxu1 %v252_v11 }
 0x10a   :  { %3760 = vmatmul.mubr.msk.f32.vlgmr.msra.gmra.mxu1 %vm264_vm0, %v4472_v14  ;;  %3765 = vmatprep.subr.bf16.mxu1 %v4189_v13 }
 0x10b   :  { %3762 = vmatprep.mubr.msk.f32.mxu1 %vm264_vm0, %v262_v15  ;;  %3766 = vmatpush3.bf16.msra.mxu1 %v4189_v13 }
 0x10c   :  { %3767 = vmatprep.subr.bf16.mxu1 %v4191_v16 }
 0x10e   :  { %3763 = vmatmul.mubr.msk.f32.gmra.mxu1 %vm264_vm0, %v263_v17 }
 0x10f   :  { %3768 = vmatpush3.bf16.msra.mxu1 %v4191_v16 }
 0x110   :  { %3769 = vmatprep.subr.bf16.mxu1 %v4193_v18 }
 0x113   :  { %3770 = vmatpush3.bf16.msra.mxu1 %v4193_v18 }
 0x114   :  { %3771 = vmatprep.subr.bf16.mxu1 %v4195_v19 }
 0x117   :  { %3772 = vmatpush3.bf16.msra.mxu1 %v4195_v19 }
 0x118   :  { %3773 = vmatprep.subr.bf16.mxu1 %v4197_v20 }
 0x11b   :  { %3774 = vmatpush3.bf16.msra.mxu1 %v4197_v20 }
 0x11c   :  { %3775 = vmatprep.subr.bf16.mxu1 %v4199_v21 }
 0x11f   :  { %3776 = vmatpush3.bf16.msra.mxu1 %v4199_v21 }
 0x120   :  { %3777 = vmatprep.subr.bf16.mxu1 %v4201_v23 }
 0x123   :  { %3778 = vmatpush3.bf16.msra.mxu1 %v4201_v23 }
 0x124   :  { %3779 = vmatprep.subr.bf16.mxu1 %v4203_v25 }
 0x127   :  { %3780 = vmatpush3.bf16.msra.mxu1 %v4203_v25 }
 0x128   :  { %3805 = vmatprep.subr.bf16.mxu1 %v4204_v26 }
 0x1ca   :  { %v3761_v32 = vpop.f32.mrf.mxu1 }
 0x1cb   :  { %v368_v36 = vrot.slane %v3761_v32, 7  ;;  %v397_v43 = vrot.slane %v3761_v32, 1 }
 0x1cc   :  { %v343_v33 = vpop.f32.mrf.mxu1 }
 0x1cd   :  { %v367_v37 = vrot.slane %v343_v33, 7  ;;  %v416_v38 = vpack.c.bf16 %v3761_v32, %v343_v33  ;;  %v396_v42 = vrot.slane %v343_v33, 1 }
 0x1ce   :  { %v3764_v39 = vpop.f32.mrf.mxu1 }
 0x1cf   :  { %v369_v40 = vsel %vm366_vm2, %v367_v37, %v368_v36  ;;  %v378_v41 = vsel %vm366_vm2, 0.0, %v367_v37  ;;  %3801 = vmatprep.mubr.bf16.mxu0 %v416_v38  ;;  %v372_v46 = vrot.slane %v3764_v39, 7  ;;  %v398_v50 = vsel %vm227_vm1, %v396_v42, %v397_v43 }
 0x1d0   :  { %v3046_v44 = vpack.c.bf16 %v369_v40, %v378_v41  ;;  %v353_v45 = vpop.f32.mrf.mxu1  ;;  %v401_v1 = vrot.slane %v3764_v39, 1 }
 0x1d1   :  { %v370_v47 = vrot.slane %v353_v45, 7  ;;  %v399_v48 = vrot.slane %v353_v45, 1  ;;  %v417_v49 = vpack.c.bf16 %v3764_v39, %v353_v45 }
 0x1d2   :  { %3781 = vmatprep.mubr.msk.bf16.mxu1 %vm3045_vm5, %v3046_v44  ;;  %v407_v3 = vsel %vm227_vm1, %v401_v1, 0.0 }
 0x1d3   :  { %v371_v51 = vsel %vm366_vm2, %v368_v36, %v370_v47  ;;  %v373_v52 = vsel %vm366_vm2, %v370_v47, %v372_v46  ;;  %v400_v53 = vsel %vm227_vm1, %v397_v43, %v399_v48  ;;  %3802 = vmatmul.mubr.bf16.vlgmr.msra.gmra.mxu0 %v417_v49  ;;  %v402_v2 = vsel %vm227_vm1, %v399_v48, %v401_v1  ;;  %v4224_v1 = vld [vmem:[%s5248_s2 + $0x108] sm:$0xff]  }
 0x1d4   :  { %v3049_v54 = vpack.c.bf16 %v373_v52, %v371_v51  ;;  %v3084_v55 = vpack.c.bf16 %v400_v53, %v398_v50  ;;  %v3087_v4 = vpack.c.bf16 %v407_v3, %v402_v2  ;;  %3837 = vmatpush3.bf16.msra.mxu0 %v4213_v6  ;;  %v4225_v2 = vld [vmem:[%s5248_s2 + $0xc8] sm:$0xff]   ;;  %v4226_v3 = vld [vmem:[%s5248_s2 + $0x100] sm:$0xff]   ;;  %3852 = vmatprep.mubr.msk.bf16.mxu0 %vm4343_vm13, %v4342_v5  ;;  %v899_v6 = vand.u32 7, %v4514_v28 }
 0x1d5   :  { %3838 = vmatprep.subr.bf16.mxu0 %v4342_v5 }
 0x1d6   :  { %3782 = vmatmul.mubr.msk.bf16.vlgmr.msra.gmra.mxu1 %vm3048_vm8, %v3049_v54  ;;  %vm901_vm14 = vcmp.ne.s32.totalorder %v899_v6, 0  ;;  %vm911_vm3 = vcmp.ne.s32.totalorder %v899_v6, 7  ;;  %v4241_v6 = vld [vmem:[%s5248_s2 + $0x1a8] sm:$0xff]  }
 0x1d7   :  { %3806 = vmatpush3.bf16.msra.mxu1 %v4204_v26  ;;  %3821 = vmatprep.mubr.msk.bf16.mxu1 %vm3083_vm9, %v3084_v55 }
 0x1d8   :  { %3807 = vmatprep.subr.bf16.mxu1 %v4205_v56  ;;  %3839 = vmatpush3.bf16.msra.mxu0 %v4215_v7  ;;  %v900_v7 = vand.u32 7, %v4519_v31  ;;  %v4229_v31 = vld [vmem:[%s5248_s2 + $0x170] sm:$0xff]  }
 0x1d9   :  { %3840 = vmatprep.subr.bf16.mxu0 %v4342_v5 }
 0x1da   :  { %vm902_vm15 = vcmp.ne.s32.totalorder %v900_v7, 0  ;;  %vm912_vm4 = vcmp.ne.s32.totalorder %v900_v7, 7  ;;  %v4243_v7 = vld [vmem:[%s5248_s2 + $0x1a0] sm:$0xff]  }
 0x1db   :  { %3808 = vmatpush3.bf16.msra.mxu1 %v4205_v56  ;;  %vm3133_vm0 = vmpackc.low %vm902_vm15, %vm901_vm14  ;;  %vm2107_vm14 = vcmask 1042432  }
 0x1dc   :  { %3809 = vmatprep.subr.bf16.mxu1 %v4206_v57  ;;  %vm3168_vm5 = vmpackc.low %vm912_vm4, %vm911_vm3  ;;  %vm2986_vm3 = vcmask 1041408   ;;  %vm2998_vm4 = vcmask 1024  }
 0x1df   :  { %3810 = vmatpush3.bf16.msra.mxu1 %v4206_v57 }
 0x1e0   :  { %3811 = vmatprep.subr.bf16.mxu1 %v4207_v58 }
 0x1e3   :  { %3812 = vmatpush3.bf16.msra.mxu1 %v4207_v58 }
 0x1e4   :  { %3813 = vmatprep.subr.bf16.mxu1 %v4208_v59 }
 0x1e7   :  { %3814 = vmatpush3.bf16.msra.mxu1 %v4208_v59 }
 0x1e8   :  { %3815 = vmatprep.subr.bf16.mxu1 %v4209_v60 }
 0x1eb   :  { %3816 = vmatpush3.bf16.msra.mxu1 %v4209_v60  ;;  %v4212_v60 = vld [vmem:[%s5248_s2 + $0x138] sm:$0xff]  }
 0x1ec   :  { %3817 = vmatprep.subr.bf16.mxu1 %v4210_v61 }
 0x1ef   :  { %3818 = vmatpush3.bf16.msra.mxu1 %v4210_v61  ;;  %v4214_v61 = vld [vmem:[%s5248_s2 + $0x130] sm:$0xff]  }
 0x1f0   :  { %3819 = vmatprep.subr.bf16.mxu1 %v4211_v63 }
 0x1f3   :  { %3820 = vmatpush3.bf16.msra.mxu1 %v4211_v63  ;;  %v4220_v63 = vld [vmem:[%s5248_s2 + $0x118] sm:$0xff]  }
 0x1f6   :  { %3822 = vmatmul.mubr.msk.bf16.vlgmr.msra.gmra.mxu1 %vm3086_vm11, %v3087_v4  ;;  %v4227_v4 = vld [vmem:[%s5248_s2 + $0xc0] sm:$0xff]   ;;  %vm2024_vm11 = vcmask 64512  }
 0x1f7   :  { %3833 = vmatprep.mubr.msk.f32.mxu1 %vm809_vm12, %v4433_v12  ;;  %v4217_v12 = vld [vmem:[%s5248_s2 + $0xe8] sm:$0xff]  }
 0x1f8   :  { %3841 = vmatpush3.bf16.msra.mxu0 %v4217_v12 }
 0x1f9   :  { %3842 = vmatprep.subr.bf16.mxu0 %v4342_v5 }
 0x1fc   :  { %3843 = vmatpush3.bf16.msra.mxu0 %v4219_v8 }
 0x1fd   :  { %3844 = vmatprep.subr.bf16.mxu0 %v4342_v5 }
 0x200   :  { %3845 = vmatpush3.bf16.msra.mxu0 %v4221_v9 }
 0x201   :  { %3846 = vmatprep.subr.bf16.mxu0 %v4342_v5 }
 0x204   :  { %3847 = vmatpush3.bf16.msra.mxu0 %v4223_v10 }
 0x205   :  { %3848 = vmatprep.subr.bf16.mxu0 %v4342_v5 }
 0x208   :  { %3849 = vmatpush3.bf16.msra.mxu0 %v4225_v2  ;;  %v4237_v2 = vld [vmem:[%s5248_s2 + $0x1b8] sm:$0xff]  }
 0x209   :  { %3850 = vmatprep.subr.bf16.mxu0 %v4342_v5 }
 0x20c   :  { %3851 = vmatpush3.bf16.msra.mxu0 %v4227_v4  ;;  %v4239_v4 = vld [vmem:[%s5248_s2 + $0x1b0] sm:$0xff]  }
 0x20d   :  { %3876 = vmatprep.subr.bf16.mxu0 %v4342_v5 }
 0x293   :  { %v3803_v15 = vpop.f32.mrf.mxu0 }
 0x295   :  { %v632_v17 = vpop.f32.mrf.mxu0 }
 0x296   :  { %v3783_v11 = vpop.f32.mrf.mxu1 }
 0x297   :  { %v641_v19 = vadd.f32 %v3803_v15, %v3783_v11  ;;  %v3804_v20 = vpop.f32.mrf.mxu0 }
 0x298   :  { %v535_v13 = vpop.f32.mrf.mxu1 }
 0x299   :  { %v633_v23 = vadd.f32 %v632_v17, %v535_v13  ;;  %v635_v30 = vpop.f32.mrf.mxu0 }
 0x29a   :  { %v3784_v16 = vpop.f32.mrf.mxu1 }
 0x29b   :  { %v644_v26 = vadd.f32 %v3804_v20, %v3784_v16  ;;  %v4228_v16 = vld [vmem:[%s5248_s2 + $0x178] sm:$0xff]  }
 0x29c   :  { %v538_v18 = vpop.f32.mrf.mxu1  ;;  %v4232_v20 = vld [vmem:[%s5248_s2 + $0x158] sm:$0xff]  }
 0x29d   :  { %v636_v33 = vadd.f32 %v635_v30, %v538_v18  ;;  %v4230_v18 = vld [vmem:[%s5248_s2 + $0x168] sm:$0xff]   ;;  %v4236_v30 = vld [vmem:[%s5248_s2 + $0x1f8] sm:$0xff]  }
 0x2b6   :  { %v3823_v21 = vpop.f32.mrf.mxu1 }
 0x2b7   :  { %v765_v24 = vadd.f32 %v3823_v21, %v641_v19  ;;  %v4231_v19 = vld [vmem:[%s5248_s2 + $0x160] sm:$0xff]   ;;  %v4233_v21 = vld [vmem:[%s5248_s2 + $0x150] sm:$0xff]  }
 0x2b8   :  { %v748_v25 = vpop.f32.mrf.mxu1 }
 0x2b9   :  { %v777_v27 = vadd.f32 %v3090_v22, %v765_v24  ;;  %v763_v29 = vadd.f32 %v748_v25, %v633_v23  ;;  %v4235_v25 = vld [vmem:[%s5248_s2 + $0x140] sm:$0xff]  }
 0x2ba   :  { %v3824_v32 = vpop.f32.mrf.mxu1 }
 0x2bb   :  { %v781_v34 = vmul.f32 0.01, %v777_v27  ;;  %v775_v35 = vadd.f32 %v3090_v22, %v763_v29  ;;  %v766_v36 = vadd.f32 %v3824_v32, %v644_v26  ;;  %v4238_v32 = vld [vmem:[%s5248_s2 + $0x1f0] sm:$0xff]  }
 0x2bc   :  { %v751_v37 = vpop.f32.mrf.mxu1 }
 0x2bd   :  { %v778_v38 = vadd.f32 %v3090_v22, %v766_v36  ;;  %v764_v39 = vadd.f32 %v751_v37, %v636_v33  ;;  %v785_v40 = vmax.f32 %v777_v27, %v781_v34  ;;  %v779_v41 = vmul.f32 0.01, %v775_v35  ;;  %v4240_v33 = vld [vmem:[%s5248_s2 + $0x1e8] sm:$0xff]   ;;  %v4242_v34 = vld [vmem:[%s5248_s2 + $0x1e0] sm:$0xff]   ;;  %v4246_v36 = vld [vmem:[%s5248_s2 + $0x1d0] sm:$0xff]  }
 0x2be   :  { %v4248_v37 = vld [vmem:[%s5248_s2 + $0x1c8] sm:$0xff]  }
 0x2bf   :  { %v782_v42 = vmul.f32 0.01, %v778_v38  ;;  %v776_v43 = vadd.f32 %v3090_v22, %v764_v39  ;;  %v794_v46 = vrot.slane %v785_v40, 1  ;;  %v783_v47 = vmax.f32 %v775_v35, %v779_v41  ;;  %v4234_v22 = vld [vmem:[%s5248_s2 + $0x148] sm:$0xff]   ;;  %v4244_v35 = vld [vmem:[%s5248_s2 + $0x1d8] sm:$0xff]  }
 0x2c1   :  { %v786_v44 = vmax.f32 %v778_v38, %v782_v42  ;;  %v780_v45 = vmul.f32 0.01, %v776_v43  ;;  %v791_v54 = vrot.slane %v783_v47, 1 }
 0x2c3   :  { %v796_v48 = vrot.slane %v786_v44, 1  ;;  %v784_v49 = vmax.f32 %v776_v43, %v780_v45 }
 0x2c5   :  { %v792_v50 = vrot.slane %v784_v49, 1  ;;  %v802_v51 = vsel %vm227_vm1, %v796_v48, 0.0  ;;  %v797_v52 = vsel %vm227_vm1, %v794_v46, %v796_v48  ;;  %v3172_v48 = vld [vmem:[%s5249_s3 + $0x2] ss:$0 sm:$0xff] }
 0x2c6   :  { %v806_v53 = vmax.f32 %v786_v44, %v802_v51  ;;  %v805_v56 = vmax.f32 %v785_v40, %v797_v52 }
 0x2c7   :  { %v795_v55 = vsel %vm227_vm1, %v792_v50, %v794_v46  ;;  %v793_v57 = vsel %vm227_vm1, %v791_v54, %v792_v50 }
 0x2c8   :  { %3825 = vmatprep.subr.mxu1 %v806_v53  ;;  %v804_v58 = vmax.f32 %v784_v49, %v795_v55  ;;  %v803_v59 = vmax.f32 %v783_v47, %v793_v57 }
 0x2c9   :  { %3826 = vmatpush3.msra.mxu1 %v806_v53 }
 0x2ca   :  { %3827 = vmatprep.subr.mxu1 %v805_v56 }
 0x2cb   :  { %3828 = vmatpush3.msra.mxu1 %v805_v56 }
 0x2cc   :  { %3829 = vmatprep.subr.mxu1 %v804_v58 }
 0x2cd   :  { %3830 = vmatpush3.msra.mxu1 %v804_v58 }
 0x2ce   :  { %3831 = vmatprep.subr.mxu1 %v803_v59 }
 0x2cf   :  { %3832 = vmatpush3.msra.mxu1 %v803_v59 }
 0x2d0   :  { %3834 = vmatmul.mubr.msk.f32.vlgmr.msra.gmra.mxu1 %vm809_vm12, %v4472_v14  ;;  %3856 = vmatprep.subr.bf16.mxu1 %v4342_v5  ;;  %v4218_v14 = vld [vmem:[%s5248_s2 + $0x120] sm:$0xff]  }
 0x2d1   :  { %3857 = vmatpush3.bf16.msra.mxu1 %v4212_v60  ;;  %3872 = vmatprep.mubr.msk.bf16.mxu1 %vm4343_vm13, %v4342_v5 }
 0x2d2   :  { %3858 = vmatprep.subr.bf16.mxu1 %v4342_v5 }
 0x2d5   :  { %3859 = vmatpush3.bf16.msra.mxu1 %v4214_v61 }
 0x2d6   :  { %3860 = vmatprep.subr.bf16.mxu1 %v4342_v5 }
 0x2d9   :  { %3861 = vmatpush3.bf16.msra.mxu1 %v4216_v62 }
 0x2da   :  { %3862 = vmatprep.subr.bf16.mxu1 %v4342_v5 }
 0x2dd   :  { %3863 = vmatpush3.bf16.msra.mxu1 %v4218_v14 }
 0x2de   :  { %3864 = vmatprep.subr.bf16.mxu1 %v4342_v5 }
 0x2e1   :  { %3865 = vmatpush3.bf16.msra.mxu1 %v4220_v63 }
 0x2e2   :  { %3866 = vmatprep.subr.bf16.mxu1 %v4342_v5 }
 0x2e5   :  { %3867 = vmatpush3.bf16.msra.mxu1 %v4222_v0 }
 0x2e6   :  { %3868 = vmatprep.subr.bf16.mxu1 %v4342_v5 }
 0x2e9   :  { %3869 = vmatpush3.bf16.msra.mxu1 %v4224_v1 }
 0x2ea   :  { %3870 = vmatprep.subr.bf16.mxu1 %v4342_v5 }
 0x2ed   :  { %3871 = vmatpush3.bf16.msra.mxu1 %v4226_v3  ;;  %v4340_v3 = vld [vmem:[%s5247_s4] sm:$0xff] }
 0x2ee   :  { %3896 = vmatprep.subr.mxu1 %v4342_v5 }
 0x390   :  { %v3835_v12 = vpop.f32.mrf.mxu1 }
 0x391   :  { %v894_v9 = vrot.slane %v3835_v12, 7  ;;  %v906_v24 = vrot.slane %v3835_v12, 1 }
 0x392   :  { %v882_v8 = vpop.f32.mrf.mxu1 }
 0x393   :  { %v893_v10 = vrot.slane %v882_v8, 7  ;;  %v915_v11 = vpack.c.bf16 %v3835_v12, %v882_v8  ;;  %v905_v23 = vrot.slane %v882_v8, 1  ;;  %v910_v27 = vsel %vm227_vm1, %v906_v24, 0.0  ;;  %v4245_v12 = vld [vmem:[%s5248_s2 + $0x198] sm:$0xff]   ;;  %v4247_v8 = vld [vmem:[%s5248_s2 + $0x190] sm:$0xff]  }
 0x395   :  { %v895_v13 = vsel %vm366_vm2, %v893_v10, %v894_v9  ;;  %v898_v15 = vsel %vm366_vm2, 0.0, %v893_v10  ;;  %3873 = vmatmul.mubr.bf16.vlgmr.msra.gmra.mxu1 %v915_v11  ;;  %v907_v26 = vsel %vm227_vm1, %v905_v23, %v906_v24  ;;  %v4249_v9 = vld [vmem:[%s5248_s2 + $0x188] sm:$0xff]   ;;  %v4250_v10 = vld [vmem:[%s5248_s2 + $0x1c0] sm:$0xff]  }
 0x396   :  { %v3134_v17 = vpack.c.bf16 %v895_v13, %v898_v15  ;;  %3900 = vmatprep.mubr.msk.f32.mxu1 %vm4343_vm13, %v4342_v5  ;;  %v3169_v29 = vpack.c.bf16 %v910_v27, %v907_v26  ;;  %v4251_v11 = vld [vmem:[%s5248_s2 + $0x180] sm:$0xff]   ;;  %v1341_v13 = vand.u32 3, %v4514_v28  ;;  %v4254_v23 = vld [vmem:[%s5248_s2 + $0x228] sm:$0xff]   ;;  %v4257_v26 = vld [vmem:[%s5248_s2 + $0x210] sm:$0xff]  }
 0x397   :  { %v4255_v24 = vld [vmem:[%s5248_s2 + $0x220] sm:$0xff]   ;;  %v4258_v27 = vld [vmem:[%s5248_s2 + $0x208] sm:$0xff]  }
 0x398   :  { %3853 = vmatmul.mubr.msk.bf16.vlgmr.msra.gmra.mxu0 %vm3133_vm0, %v3134_v17  ;;  %vm4758_vm7 = vcmp.ne.s32.totalorder %v1341_v13, 0  ;;  %vm4806_vm9 = vcmp.ne.s32.totalorder %v1341_v13, 3  ;;  %v4280_v13 = vld [vmem:[%s5248_s2 + $0x2d8] sm:$0xff]  }
 0x399   :  { %3877 = vmatpush3.bf16.msra.mxu0 %v4228_v16  ;;  %3892 = vmatprep.mubr.msk.bf16.mxu0 %vm4343_vm13, %v4342_v5  ;;  %vm3214_vm8 = vmpackc.low %vm4758_vm7, %vm4758_vm7  ;;  %v4282_v16 = vld [vmem:[%s5248_s2 + $0x2c8] sm:$0xff]  }
 0x39a   :  { %3878 = vmatprep.subr.bf16.mxu0 %v4342_v5  ;;  %vm3249_vm10 = vmpackc.low %vm4806_vm9, %vm4806_vm9 }
 0x39d   :  { %3879 = vmatpush3.bf16.msra.mxu0 %v4229_v31 }
 0x39e   :  { %3880 = vmatprep.subr.bf16.mxu0 %v4342_v5 }
 0x3a1   :  { %3881 = vmatpush3.bf16.msra.mxu0 %v4230_v18 }
 0x3a2   :  { %3882 = vmatprep.subr.bf16.mxu0 %v4342_v5 }
 0x3a5   :  { %3883 = vmatpush3.bf16.msra.mxu0 %v4231_v19 }
 0x3a6   :  { %3884 = vmatprep.subr.bf16.mxu0 %v4342_v5 }
 0x3a9   :  { %3885 = vmatpush3.bf16.msra.mxu0 %v4232_v20  ;;  %v4252_v20 = vld [vmem:[%s5248_s2 + $0x238] sm:$0xff]  }
 0x3aa   :  { %3886 = vmatprep.subr.bf16.mxu0 %v4342_v5 }
 0x3ad   :  { %3887 = vmatpush3.bf16.msra.mxu0 %v4233_v21 }
 0x3ae   :  { %3888 = vmatprep.subr.bf16.mxu0 %v4342_v5 }
 0x3b1   :  { %3889 = vmatpush3.bf16.msra.mxu0 %v4234_v22  ;;  %v4253_v22 = vld [vmem:[%s5248_s2 + $0x230] sm:$0xff]  }
 0x3b2   :  { %3890 = vmatprep.subr.bf16.mxu0 %v4342_v5 }
 0x3b5   :  { %3891 = vmatpush3.bf16.msra.mxu0 %v4235_v25  ;;  %v4256_v25 = vld [vmem:[%s5248_s2 + $0x218] sm:$0xff]  }
 0x3b6   :  { %3923 = vmatprep.subr.bf16.mxu0 %v4342_v5 }
 0x3b8   :  { %3893 = vmatmul.mubr.msk.bf16.vlgmr.msra.gmra.mxu0 %vm3168_vm5, %v3169_v29 }
 0x3b9   :  { %3939 = vmatprep.mubr.msk.bf16.mxu0 %vm4343_vm13, %v4342_v5  ;;  %3924 = vmatpush3.bf16.msra.mxu0 %v4236_v30  ;;  %v4259_v30 = vld [vmem:[%s5248_s2 + $0x200] sm:$0xff]  }
 0x3ba   :  { %3925 = vmatprep.subr.bf16.mxu0 %v4342_v5 }
 0x3bd   :  { %3926 = vmatpush3.bf16.msra.mxu0 %v4238_v32 }
 0x3be   :  { %3927 = vmatprep.subr.bf16.mxu0 %v4342_v5 }
 0x3c1   :  { %3928 = vmatpush3.bf16.msra.mxu0 %v4240_v33 }
 0x3c2   :  { %3929 = vmatprep.subr.bf16.mxu0 %v4342_v5 }
 0x3c5   :  { %3930 = vmatpush3.bf16.msra.mxu0 %v4242_v34 }
 0x3c6   :  { %3931 = vmatprep.subr.bf16.mxu0 %v4342_v5 }
 0x3c9   :  { %3932 = vmatpush3.bf16.msra.mxu0 %v4244_v35  ;;  %v4260_v35 = vld [vmem:[%s5248_s2 + $0x2b8] sm:$0xff]  }
 0x3ca   :  { %3933 = vmatprep.subr.bf16.mxu0 %v4342_v5 }
 0x3cd   :  { %3934 = vmatpush3.bf16.msra.mxu0 %v4246_v36  ;;  %v4261_v36 = vld [vmem:[%s5248_s2 + $0x278] sm:$0xff]  }
 0x3ce   :  { %3935 = vmatprep.subr.bf16.mxu0 %v4342_v5 }
 0x3d1   :  { %3936 = vmatpush3.bf16.msra.mxu0 %v4248_v37  ;;  %v4262_v37 = vld [vmem:[%s5248_s2 + $0x2b0] sm:$0xff]  }
 0x3d2   :  { %3937 = vmatprep.subr.bf16.mxu0 %v4342_v5 }
 0x3d5   :  { %3938 = vmatpush3.bf16.msra.mxu0 %v4250_v10  ;;  %v4278_v10 = vld [vmem:[%s5248_s2 + $0x2e8] sm:$0xff]  }
 0x3d6   :  { %3963 = vmatprep.subr.bf16.mxu0 %v4342_v5 }
 0x455   :  { %v1122_v38 = vpop.f32.mrf.mxu1 }
 0x457   :  { %v3874_v39 = vpop.f32.mrf.mxu1 }
 0x458   :  { %v1033_v40 = vpop.f32.mrf.mxu0  ;;  %v4264_v39 = vld [vmem:[%s5248_s2 + $0x2a8] sm:$0xff]  }
 0x459   :  { %v1125_v41 = vpop.f32.mrf.mxu1  ;;  %v1123_v46 = vadd.f32 %v1122_v38, %v1033_v40  ;;  %v4263_v38 = vld [vmem:[%s5248_s2 + $0x270] sm:$0xff]   ;;  %v4265_v40 = vld [vmem:[%s5248_s2 + $0x268] sm:$0xff]  }
 0x45a   :  { %v3854_v42 = vpop.f32.mrf.mxu0 }
 0x45b   :  { %v3875_v43 = vpop.f32.mrf.mxu1  ;;  %v4267_v42 = vld [vmem:[%s5248_s2 + $0x260] sm:$0xff]  }
 0x45c   :  { %v1036_v44 = vpop.f32.mrf.mxu0  ;;  %v4268_v43 = vld [vmem:[%s5248_s2 + $0x298] sm:$0xff]  }
 0x45d   :  { %v1126_v51 = vadd.f32 %v1125_v41, %v1036_v44  ;;  %v4266_v41 = vld [vmem:[%s5248_s2 + $0x2a0] sm:$0xff]   ;;  %v4269_v44 = vld [vmem:[%s5248_s2 + $0x258] sm:$0xff]  }
 0x45e   :  { %v3855_v45 = vpop.f32.mrf.mxu0 }
 0x45f   :  { %v4270_v45 = vld [vmem:[%s5248_s2 + $0x290] sm:$0xff]  }
 0x478   :  { %v1229_v47 = vpop.f32.mrf.mxu0 }
 0x479   :  { %v1236_v49 = vadd.f32 %v1229_v47, %v1123_v46  ;;  %v4271_v46 = vld [vmem:[%s5248_s2 + $0x250] sm:$0xff]   ;;  %v4272_v47 = vld [vmem:[%s5248_s2 + $0x288] sm:$0xff]  }
 0x47a   :  { %v3894_v50 = vpop.f32.mrf.mxu0 }
 0x47b   :  { %v1246_v52 = vadd.f32 %v3172_v48, %v1236_v49  ;;  %v4274_v49 = vld [vmem:[%s5248_s2 + $0x280] sm:$0xff]  }
 0x47c   :  { %v1232_v53 = vpop.f32.mrf.mxu0  ;;  %v4275_v50 = vld [vmem:[%s5248_s2 + $0x240] sm:$0xff]  }
 0x47d   :  { %v1248_v54 = vmul.f32 0.01, %v1246_v52  ;;  %v1237_v55 = vadd.f32 %v1232_v53, %v1126_v51 }
 0x47e   :  { %v3895_v56 = vpop.f32.mrf.mxu0 }
 0x47f   :  { %v1247_v57 = vadd.f32 %v3172_v48, %v1237_v55  ;;  %v1250_v58 = vmax.f32 %v1246_v52, %v1248_v54  ;;  %v4273_v48 = vld [vmem:[%s5248_s2 + $0x248] sm:$0xff]  }
 0x481   :  { %v1249_v59 = vmul.f32 0.01, %v1247_v57  ;;  %v1254_v61 = vrot.slane %v1250_v58, 1 }
 0x483   :  { %v1251_v60 = vmax.f32 %v1247_v57, %v1249_v59 }
 0x485   :  { %v1255_v62 = vrot.slane %v1251_v60, 1 }
 0x487   :  { %v1259_v14 = vsel %vm227_vm1, %v1255_v62, 0.0  ;;  %v1256_v63 = vsel %vm227_vm1, %v1254_v61, %v1255_v62  ;;  %v3253_v61 = vld [vmem:[%s5249_s3 + $0x3] ss:$0 sm:$0xff] }
 0x488   :  { %v1261_v0 = vmax.f32 %v1251_v60, %v1259_v14  ;;  %v1260_v1 = vmax.f32 %v1250_v58, %v1256_v63 }
 0x48a   :  { %3897 = vmatpush3.msra.mxu1 %v1261_v0 }
 0x48b   :  { %3898 = vmatprep.subr.mxu1 %v4342_v5 }
 0x48c   :  { %3899 = vmatpush3.msra.mxu1 %v1260_v1 }
 0x48d   :  { %3901 = vmatmul.mubr.msk.f32.vlgmr.msra.gmra.mxu1 %vm1263_vm6, %v4340_v3  ;;  %3903 = vmatprep.subr.bf16.mxu1 %v4342_v5 }
 0x48e   :  { %3904 = vmatpush3.bf16.msra.mxu1 %v4237_v2  ;;  %3919 = vmatprep.mubr.msk.bf16.mxu1 %vm4343_vm13, %v4342_v5 }
 0x48f   :  { %3905 = vmatprep.subr.bf16.mxu1 %v4342_v5 }
 0x492   :  { %3906 = vmatpush3.bf16.msra.mxu1 %v4239_v4 }
 0x493   :  { %3907 = vmatprep.subr.bf16.mxu1 %v4342_v5 }
 0x496   :  { %3908 = vmatpush3.bf16.msra.mxu1 %v4241_v6 }
 0x497   :  { %3909 = vmatprep.subr.bf16.mxu1 %v4342_v5 }
 0x49a   :  { %3910 = vmatpush3.bf16.msra.mxu1 %v4243_v7 }
 0x49b   :  { %3911 = vmatprep.subr.bf16.mxu1 %v4342_v5 }
 0x49e   :  { %3912 = vmatpush3.bf16.msra.mxu1 %v4245_v12  ;;  %v4276_v12 = vld [vmem:[%s5248_s2 + $0x2f8] sm:$0xff]  }
 0x49f   :  { %3913 = vmatprep.subr.bf16.mxu1 %v4342_v5 }
 0x4a2   :  { %3914 = vmatpush3.bf16.msra.mxu1 %v4247_v8 }
 0x4a3   :  { %3915 = vmatprep.subr.bf16.mxu1 %v4342_v5 }
 0x4a6   :  { %3916 = vmatpush3.bf16.msra.mxu1 %v4249_v9  ;;  %v4277_v9 = vld [vmem:[%s5248_s2 + $0x2f0] sm:$0xff]  }
 0x4a7   :  { %3917 = vmatprep.subr.bf16.mxu1 %v4342_v5 }
 0x4aa   :  { %3918 = vmatpush3.bf16.msra.mxu1 %v4251_v11  ;;  %v4279_v11 = vld [vmem:[%s5248_s2 + $0x2e0] sm:$0xff]  }
 0x4ab   :  { %3943 = vmatprep.subr.bf16.mxu1 %v4342_v5 }
 0x54d   :  { %v1333_v15 = vpop.f32.mrf.mxu1 }
 0x54e   :  { %v1338_v17 = vrot.slane %v1333_v15, 7  ;;  %v1349_v31 = vpack.c.bf16 %v1333_v15, %v1333_v15  ;;  %v1344_v29 = vrot.slane %v1333_v15, 1  ;;  %v4281_v15 = vld [vmem:[%s5248_s2 + $0x2d0] sm:$0xff]  }
 0x54f   :  { %v3902_v18 = vpop.f32.mrf.mxu1 }
 0x550   :  { %v1340_v19 = vsel %vm366_vm2, 0.0, %v1338_v17  ;;  %3940 = vmatmul.mubr.bf16.vlgmr.msra.gmra.mxu0 %v1349_v31  ;;  %v1346_v33 = vsel %vm227_vm1, %v1344_v29, 0.0  ;;  %v4283_v31 = vld [vmem:[%s5248_s2 + $0x2c0] sm:$0xff]  }
 0x551   :  { %v3215_v21 = vpack.c.bf16 %v1340_v19, %v1340_v19  ;;  %3979 = vmatprep.mubr.msk.bf16.mxu0 %vm4343_vm13, %v4342_v5  ;;  %v3250_v34 = vpack.c.bf16 %v1346_v33, %v1346_v33  ;;  %3964 = vmatpush3.bf16.msra.mxu0 %v4261_v36 }
 0x552   :  { %3965 = vmatprep.subr.bf16.mxu0 %v4342_v5 }
 0x553   :  { %3920 = vmatmul.mubr.msk.bf16.vlgmr.msra.gmra.mxu1 %vm3214_vm8, %v3215_v21  ;;  %v4286_v21 = vld [vmem:[%s5248_s2 + $0x370] sm:$0xff]  }
 0x554   :  { %3944 = vmatpush3.bf16.msra.mxu1 %v4252_v20  ;;  %3959 = vmatprep.mubr.msk.bf16.mxu1 %vm4343_vm13, %v4342_v5  ;;  %v4284_v20 = vld [vmem:[%s5248_s2 + $0x378] sm:$0xff]  }
 0x555   :  { %3945 = vmatprep.subr.bf16.mxu1 %v4342_v5  ;;  %3966 = vmatpush3.bf16.msra.mxu0 %v4263_v38 }
 0x556   :  { %3967 = vmatprep.subr.bf16.mxu0 %v4342_v5 }
 0x558   :  { %3946 = vmatpush3.bf16.msra.mxu1 %v4253_v22  ;;  %v4288_v22 = vld [vmem:[%s5248_s2 + $0x368] sm:$0xff]  }
 0x559   :  { %3947 = vmatprep.subr.bf16.mxu1 %v4342_v5  ;;  %3968 = vmatpush3.bf16.msra.mxu0 %v4265_v40 }
 0x55a   :  { %3969 = vmatprep.subr.bf16.mxu0 %v4342_v5 }
 0x55c   :  { %3948 = vmatpush3.bf16.msra.mxu1 %v4254_v23  ;;  %v4290_v23 = vld [vmem:[%s5248_s2 + $0x360] sm:$0xff]  }
 0x55d   :  { %3949 = vmatprep.subr.bf16.mxu1 %v4342_v5  ;;  %3970 = vmatpush3.bf16.msra.mxu0 %v4267_v42 }
 0x55e   :  { %3971 = vmatprep.subr.bf16.mxu0 %v4342_v5 }
 0x560   :  { %3950 = vmatpush3.bf16.msra.mxu1 %v4255_v24  ;;  %v4292_v24 = vld [vmem:[%s5248_s2 + $0x358] sm:$0xff]  }
 0x561   :  { %3951 = vmatprep.subr.bf16.mxu1 %v4342_v5  ;;  %3972 = vmatpush3.bf16.msra.mxu0 %v4269_v44 }
 0x562   :  { %3973 = vmatprep.subr.bf16.mxu0 %v4342_v5 }
 0x564   :  { %3952 = vmatpush3.bf16.msra.mxu1 %v4256_v25  ;;  %v4294_v25 = vld [vmem:[%s5248_s2 + $0x350] sm:$0xff]  }
 0x565   :  { %3953 = vmatprep.subr.bf16.mxu1 %v4342_v5  ;;  %3974 = vmatpush3.bf16.msra.mxu0 %v4271_v46 }
 0x566   :  { %3975 = vmatprep.subr.bf16.mxu0 %v4342_v5 }
 0x568   :  { %3954 = vmatpush3.bf16.msra.mxu1 %v4257_v26  ;;  %v4296_v26 = vld [vmem:[%s5248_s2 + $0x348] sm:$0xff]  }
 0x569   :  { %3955 = vmatprep.subr.bf16.mxu1 %v4342_v5  ;;  %3976 = vmatpush3.bf16.msra.mxu0 %v4273_v48 }
 0x56a   :  { %3977 = vmatprep.subr.bf16.mxu0 %v4342_v5 }
 0x56c   :  { %3956 = vmatpush3.bf16.msra.mxu1 %v4258_v27 }
 0x56d   :  { %3957 = vmatprep.subr.bf16.mxu1 %v4342_v5  ;;  %3978 = vmatpush3.bf16.msra.mxu0 %v4275_v50  ;;  %v2023_v50 = vld [vmem:[%s5247_s4] sm:$0xf] }
 0x56e   :  { %4003 = vmatprep.subr.bf16.mxu0 %v4342_v5 }
 0x570   :  { %3958 = vmatpush3.bf16.msra.mxu1 %v4259_v30 }
 0x571   :  { %3983 = vmatprep.subr.bf16.mxu1 %v4342_v5 }
 0x573   :  { %3960 = vmatmul.mubr.msk.bf16.vlgmr.msra.gmra.mxu1 %vm3249_vm10, %v3250_v34 }
 0x574   :  { %3999 = vmatprep.mubr.msk.bf16.mxu1 %vm4343_vm13, %v4342_v5  ;;  %3984 = vmatpush3.bf16.msra.mxu1 %v4260_v35 }
 0x575   :  { %3985 = vmatprep.subr.bf16.mxu1 %v4342_v5 }
 0x578   :  { %3986 = vmatpush3.bf16.msra.mxu1 %v4262_v37 }
 0x579   :  { %3987 = vmatprep.subr.bf16.mxu1 %v4342_v5 }
 0x57c   :  { %3988 = vmatpush3.bf16.msra.mxu1 %v4264_v39  ;;  %v3333_v39 = vld [vmem:[%s5249_s3 + $0x4] ss:$0 sm:$0xff] }
 0x57d   :  { %3989 = vmatprep.subr.bf16.mxu1 %v4342_v5 }
 0x580   :  { %3990 = vmatpush3.bf16.msra.mxu1 %v4266_v41 }
 0x581   :  { %3991 = vmatprep.subr.bf16.mxu1 %v4342_v5 }
 0x584   :  { %3992 = vmatpush3.bf16.msra.mxu1 %v4268_v43 }
 0x585   :  { %3993 = vmatprep.subr.bf16.mxu1 %v4342_v5 }
 0x588   :  { %3994 = vmatpush3.bf16.msra.mxu1 %v4270_v45 }
 0x589   :  { %3995 = vmatprep.subr.bf16.mxu1 %v4342_v5 }
 0x58c   :  { %3996 = vmatpush3.bf16.msra.mxu1 %v4272_v47 }
 0x58d   :  { %3997 = vmatprep.subr.bf16.mxu1 %v4342_v5 }
 0x590   :  { %3998 = vmatpush3.bf16.msra.mxu1 %v4274_v49 }
 0x591   :  { %4023 = vmatprep.subr.mxu1 %v4342_v5 }
 0x610   :  { %v1555_v51 = vpop.f32.mrf.mxu0 }
 0x612   :  { %v3941_v52 = vpop.f32.mrf.mxu0 }
 0x613   :  { %v1467_v53 = vpop.f32.mrf.mxu1  ;;  %v4287_v52 = vld [vmem:[%s5248_s2 + $0x330] sm:$0xff]  }
 0x614   :  { %v1558_v54 = vpop.f32.mrf.mxu0  ;;  %v1556_v59 = vadd.f32 %v1555_v51, %v1467_v53  ;;  %v4285_v51 = vld [vmem:[%s5248_s2 + $0x338] sm:$0xff]   ;;  %v4289_v53 = vld [vmem:[%s5248_s2 + $0x328] sm:$0xff]  }
 0x615   :  { %v3921_v55 = vpop.f32.mrf.mxu1  ;;  %v4291_v54 = vld [vmem:[%s5248_s2 + $0x320] sm:$0xff]  }
 0x616   :  { %v3942_v56 = vpop.f32.mrf.mxu0  ;;  %v4293_v55 = vld [vmem:[%s5248_s2 + $0x318] sm:$0xff]  }
 0x617   :  { %v1470_v57 = vpop.f32.mrf.mxu1  ;;  %v4295_v56 = vld [vmem:[%s5248_s2 + $0x310] sm:$0xff]  }
 0x618   :  { %v4297_v57 = vld [vmem:[%s5248_s2 + $0x308] sm:$0xff]  }
 0x619   :  { %v3922_v58 = vpop.f32.mrf.mxu1 }
 0x61a   :  { %v4298_v58 = vld [vmem:[%s5248_s2 + $0x340] sm:$0xff]  }
 0x633   :  { %v1661_v60 = vpop.f32.mrf.mxu1 }
 0x634   :  { %v1667_v62 = vadd.f32 %v1661_v60, %v1556_v59  ;;  %v4299_v59 = vld [vmem:[%s5248_s2 + $0x300] sm:$0xff]   ;;  %v2102_v60 = vand.u32 1, %v4514_v28 }
 0x635   :  { %v3961_v14 = vpop.f32.mrf.mxu1 }
 0x636   :  { %v1676_v63 = vadd.f32 %v3253_v61, %v1667_v62  ;;  %vm5062_vm15 = vcmp.ne.s32.totalorder %v2102_v60, 1 }
 0x637   :  { %v1664_v0 = vpop.f32.mrf.mxu1  ;;  %vm3410_vm0 = vmpackc.low %vm5062_vm15, %vm5062_vm15 }
 0x638   :  { %v1677_v1 = vmul.f32 0.01, %v1676_v63 }
 0x639   :  { %v3962_v2 = vpop.f32.mrf.mxu1 }
 0x63a   :  { %v1678_v3 = vmax.f32 %v1676_v63, %v1677_v1  ;;  %v4300_v2 = vld [vmem:[%s5248_s2 + $0x3b8] sm:$0xff]  }
 0x63c   :  { %v1680_v4 = vrot.slane %v1678_v3, 7  ;;  %v1688_v6 = vpack.c.bf16 %v1678_v3, %v1678_v3  ;;  %v1684_v17 = vrot.slane %v1678_v3, 1  ;;  %v4301_v3 = vld [vmem:[%s5248_s2 + $0x3b0] sm:$0xff]  }
 0x63e   :  { %v1682_v7 = vsel %vm366_vm2, 0.0, %v1680_v4  ;;  %4000 = vmatmul.mubr.bf16.vlgmr.msra.gmra.mxu1 %v1688_v6  ;;  %v1686_v18 = vsel %vm227_vm1, %v1684_v17, 0.0  ;;  %v4302_v4 = vld [vmem:[%s5248_s2 + $0x3a8] sm:$0xff]   ;;  %v4303_v6 = vld [vmem:[%s5248_s2 + $0x3a0] sm:$0xff]   ;;  %v4309_v17 = vld [vmem:[%s5248_s2 + $0x3f8] sm:$0xff]  }
 0x63f   :  { %v3295_v8 = vpack.c.bf16 %v1682_v7, %v1682_v7  ;;  %4025 = vmatprep.mubr.msk.f32.mxu1 %vm4343_vm13, %v4342_v5  ;;  %v3330_v19 = vpack.c.bf16 %v1686_v18, %v1686_v18  ;;  %v4304_v7 = vld [vmem:[%s5248_s2 + $0x398] sm:$0xff]   ;;  %v4311_v18 = vld [vmem:[%s5248_s2 + $0x3f0] sm:$0xff]  }
 0x641   :  { %3980 = vmatmul.mubr.msk.bf16.vlgmr.msra.gmra.mxu0 %vm3214_vm8, %v3295_v8  ;;  %v4306_v8 = vld [vmem:[%s5248_s2 + $0x388] sm:$0xff]  }
 0x642   :  { %4004 = vmatpush3.bf16.msra.mxu0 %v4276_v12  ;;  %4019 = vmatprep.mubr.msk.bf16.mxu0 %vm4343_vm13, %v4342_v5  ;;  %v4305_v12 = vld [vmem:[%s5248_s2 + $0x390] sm:$0xff]  }
 0x643   :  { %4005 = vmatprep.subr.bf16.mxu0 %v4342_v5 }
 0x646   :  { %4006 = vmatpush3.bf16.msra.mxu0 %v4277_v9 }
 0x647   :  { %4007 = vmatprep.subr.bf16.mxu0 %v4342_v5 }
 0x64a   :  { %4008 = vmatpush3.bf16.msra.mxu0 %v4278_v10  ;;  %v4307_v10 = vld [vmem:[%s5248_s2 + $0x380] sm:$0xff]  }
 0x64b   :  { %4009 = vmatprep.subr.bf16.mxu0 %v4342_v5 }
 0x64e   :  { %4010 = vmatpush3.bf16.msra.mxu0 %v4279_v11 }
 0x64f   :  { %4011 = vmatprep.subr.bf16.mxu0 %v4342_v5 }
 0x652   :  { %4012 = vmatpush3.bf16.msra.mxu0 %v4280_v13 }
 0x653   :  { %4013 = vmatprep.subr.bf16.mxu0 %v4342_v5 }
 0x656   :  { %4014 = vmatpush3.bf16.msra.mxu0 %v4281_v15 }
 0x657   :  { %4015 = vmatprep.subr.bf16.mxu0 %v4342_v5 }
 0x65a   :  { %4016 = vmatpush3.bf16.msra.mxu0 %v4282_v16  ;;  %v4308_v16 = vld [vmem:[%s5248_s2 + $0x438] sm:$0xff]  }
 0x65b   :  { %4017 = vmatprep.subr.bf16.mxu0 %v4342_v5 }
 0x65e   :  { %4018 = vmatpush3.bf16.msra.mxu0 %v4283_v31  ;;  %v4310_v31 = vld [vmem:[%s5248_s2 + $0x430] sm:$0xff]  }
 0x65f   :  { %4048 = vmatprep.subr.bf16.mxu0 %v4342_v5 }
 0x661   :  { %4020 = vmatmul.mubr.msk.bf16.vlgmr.msra.gmra.mxu0 %vm3249_vm10, %v3330_v19  ;;  %v4312_v19 = vld [vmem:[%s5248_s2 + $0x428] sm:$0xff]  }
 0x662   :  { %4064 = vmatprep.mubr.msk.bf16.mxu0 %vm4343_vm13, %v4342_v5  ;;  %4049 = vmatpush3.bf16.msra.mxu0 %v4284_v20  ;;  %v4313_v20 = vld [vmem:[%s5248_s2 + $0x3e8] sm:$0xff]  }
 0x663   :  { %4050 = vmatprep.subr.bf16.mxu0 %v4342_v5 }
 0x666   :  { %4051 = vmatpush3.bf16.msra.mxu0 %v4286_v21  ;;  %v4314_v21 = vld [vmem:[%s5248_s2 + $0x420] sm:$0xff]  }
 0x667   :  { %4052 = vmatprep.subr.bf16.mxu0 %v4342_v5 }
 0x66a   :  { %4053 = vmatpush3.bf16.msra.mxu0 %v4288_v22  ;;  %v4315_v22 = vld [vmem:[%s5248_s2 + $0x3e0] sm:$0xff]  }
 0x66b   :  { %4054 = vmatprep.subr.bf16.mxu0 %v4342_v5 }
 0x66e   :  { %4055 = vmatpush3.bf16.msra.mxu0 %v4290_v23  ;;  %v4316_v23 = vld [vmem:[%s5248_s2 + $0x418] sm:$0xff]  }
 0x66f   :  { %4056 = vmatprep.subr.bf16.mxu0 %v4342_v5 }
 0x672   :  { %4057 = vmatpush3.bf16.msra.mxu0 %v4292_v24  ;;  %v4317_v24 = vld [vmem:[%s5248_s2 + $0x3d8] sm:$0xff]  }
 0x673   :  { %4058 = vmatprep.subr.bf16.mxu0 %v4342_v5 }
 0x676   :  { %4059 = vmatpush3.bf16.msra.mxu0 %v4294_v25  ;;  %v4318_v25 = vld [vmem:[%s5248_s2 + $0x410] sm:$0xff]  }
 0x677   :  { %4060 = vmatprep.subr.bf16.mxu0 %v4342_v5 }
 0x67a   :  { %4061 = vmatpush3.bf16.msra.mxu0 %v4296_v26  ;;  %v4319_v26 = vld [vmem:[%s5248_s2 + $0x3d0] sm:$0xff]  }
 0x67b   :  { %4062 = vmatprep.subr.bf16.mxu0 %v4342_v5 }
 0x67e   :  { %4063 = vmatpush3.bf16.msra.mxu0 %v4298_v58  ;;  %v4327_v58 = vld [vmem:[%s5248_s2 + $0x460] sm:$0xff]  }
 0x67f   :  { %4088 = vmatprep.subr.bf16.mxu0 %v4342_v5 }
 0x6fe   :  { %v1894_v27 = vpop.f32.mrf.mxu1 }
 0x700   :  { %v4001_v29 = vpop.f32.mrf.mxu1 }
 0x701   :  { %v1806_v30 = vpop.f32.mrf.mxu0  ;;  %v4321_v29 = vld [vmem:[%s5248_s2 + $0x3c8] sm:$0xff]  }
 0x702   :  { %v1897_v32 = vpop.f32.mrf.mxu1  ;;  %v1895_v37 = vadd.f32 %v1894_v27, %v1806_v30  ;;  %v4320_v27 = vld [vmem:[%s5248_s2 + $0x408] sm:$0xff]   ;;  %v4322_v30 = vld [vmem:[%s5248_s2 + $0x400] sm:$0xff]  }
 0x703   :  { %v3981_v33 = vpop.f32.mrf.mxu0  ;;  %v4323_v32 = vld [vmem:[%s5248_s2 + $0x3c0] sm:$0xff]  }
 0x704   :  { %v4002_v34 = vpop.f32.mrf.mxu1 }
 0x705   :  { %v1809_v35 = vpop.f32.mrf.mxu0 }
 0x707   :  { %v3982_v36 = vpop.f32.mrf.mxu0 }
 0x721   :  { %v2000_v38 = vpop.f32.mrf.mxu0 }
 0x722   :  { %v2006_v40 = vadd.f32 %v2000_v38, %v1895_v37 }
 0x723   :  { %v4021_v41 = vpop.f32.mrf.mxu0 }
 0x724   :  { %v2015_v42 = vadd.f32 %v3333_v39, %v2006_v40 }
 0x725   :  { %v2003_v43 = vpop.f32.mrf.mxu0 }
 0x726   :  { %v2016_v44 = vmul.f32 0.01, %v2015_v42  ;;  %v3414_v43 = vld [vmem:[%s5249_s3 + $0x5] ss:$0 sm:$0xff] }
 0x727   :  { %v4022_v45 = vpop.f32.mrf.mxu0 }
 0x728   :  { %v2017_v46 = vmax.f32 %v2015_v42, %v2016_v44 }
 0x72a   :  { %v2019_v47 = vrot.slane %v2017_v46, 1 }
 0x72c   :  { %v2021_v48 = vsel %vm227_vm1, %v2019_v47, 0.0  ;;  %vm5014_vm1 = vcmp.ne.s32.totalorder %v2102_v60, 0  ;;  %v4329_v60 = vld [vmem:[%s5248_s2 + $0x450] sm:$0xff]  }
 0x72d   :  { %v2022_v49 = vmax.f32 %v2017_v46, %v2021_v48  ;;  %vm3375_vm12 = vmpackc.low %vm5014_vm1, %vm5014_vm1 }
 0x72f   :  { %4024 = vmatpush3.msra.mxu1 %v2022_v49 }
 0x730   :  { %4026 = vmatmul.mubr.msk.f32.vlgmr.msra.gmra.mxu1 %vm2024_vm11, %v2023_v50  ;;  %4028 = vmatprep.subr.bf16.mxu1 %v4342_v5 }
 0x731   :  { %4029 = vmatpush3.bf16.msra.mxu1 %v4285_v51  ;;  %4044 = vmatprep.mubr.msk.bf16.mxu1 %vm4343_vm13, %v4342_v5 }
 0x732   :  { %4030 = vmatprep.subr.bf16.mxu1 %v4342_v5 }
 0x735   :  { %4031 = vmatpush3.bf16.msra.mxu1 %v4287_v52 }
 0x736   :  { %4032 = vmatprep.subr.bf16.mxu1 %v4342_v5 }
 0x739   :  { %4033 = vmatpush3.bf16.msra.mxu1 %v4289_v53 }
 0x73a   :  { %4034 = vmatprep.subr.bf16.mxu1 %v4342_v5 }
 0x73d   :  { %4035 = vmatpush3.bf16.msra.mxu1 %v4291_v54  ;;  %v4324_v54 = vld [vmem:[%s5248_s2 + $0x478] sm:$0xff]  }
 0x73e   :  { %4036 = vmatprep.subr.bf16.mxu1 %v4342_v5 }
 0x741   :  { %4037 = vmatpush3.bf16.msra.mxu1 %v4293_v55 }
 0x742   :  { %4038 = vmatprep.subr.bf16.mxu1 %v4342_v5 }
 0x745   :  { %4039 = vmatpush3.bf16.msra.mxu1 %v4295_v56  ;;  %v4325_v56 = vld [vmem:[%s5248_s2 + $0x470] sm:$0xff]  }
 0x746   :  { %4040 = vmatprep.subr.bf16.mxu1 %v4342_v5 }
 0x749   :  { %4041 = vmatpush3.bf16.msra.mxu1 %v4297_v57  ;;  %v4326_v57 = vld [vmem:[%s5248_s2 + $0x468] sm:$0xff]  }
 0x74a   :  { %4042 = vmatprep.subr.bf16.mxu1 %v4342_v5 }
 0x74d   :  { %4043 = vmatpush3.bf16.msra.mxu1 %v4299_v59  ;;  %v4328_v59 = vld [vmem:[%s5248_s2 + $0x458] sm:$0xff]  }
 0x74e   :  { %4068 = vmatprep.subr.bf16.mxu1 %v4342_v5 }
 0x7f0   :  { %v2094_v61 = vpop.f32.mrf.mxu1 }
 0x7f1   :  { %v2099_v14 = vrot.slane %v2094_v61, 7  ;;  %v2111_v63 = vpack.c.bf16 %v2094_v61, %v2094_v61  ;;  %v2105_v9 = vrot.slane %v2094_v61, 1  ;;  %v4330_v61 = vld [vmem:[%s5248_s2 + $0x448] sm:$0xff]  }
 0x7f2   :  { %v4027_v0 = vpop.f32.mrf.mxu1 }
 0x7f3   :  { %v2101_v1 = vsel %vm366_vm2, 0.0, %v2099_v14  ;;  %4065 = vmatmul.mubr.bf16.vlgmr.msra.gmra.mxu0 %v2111_v63  ;;  %v2108_v13 = vsel %vm2107_vm14, %v2105_v9, 0.0  ;;  %v4331_v14 = vld [vmem:[%s5248_s2 + $0x440] sm:$0xff]  }
 0x7f4   :  { %v3376_v28 = vpack.c.bf16 %v2101_v1, %v2101_v1  ;;  %4104 = vmatprep.mubr.msk.bf16.mxu0 %vm4343_vm13, %v4342_v5  ;;  %v3411_v15 = vpack.c.bf16 %v2108_v13, %v2108_v13  ;;  %4089 = vmatpush3.bf16.msra.mxu0 %v4309_v17  ;;  %v4332_v1 = vld [vmem:[%s5250_s5 + $0x38] sm:$0xff]  }
 0x7f5   :  { %4090 = vmatprep.subr.bf16.mxu0 %v4342_v5 }
 0x7f6   :  { %4045 = vmatmul.mubr.msk.bf16.vlgmr.msra.gmra.mxu1 %vm3375_vm12, %v3376_v28  ;;  %v4334_v28 = vld [vmem:[%s5250_s5 + $0x28] sm:$0xff]  }
 0x7f7   :  { %4069 = vmatpush3.bf16.msra.mxu1 %v4300_v2  ;;  %4084 = vmatprep.mubr.msk.bf16.mxu1 %vm4343_vm13, %v4342_v5  ;;  %v4333_v2 = vld [vmem:[%s5250_s5 + $0x30] sm:$0xff]  }
 0x7f8   :  { %4070 = vmatprep.subr.bf16.mxu1 %v4342_v5  ;;  %4091 = vmatpush3.bf16.msra.mxu0 %v4311_v18  ;;  %v3494_v18 = vld [vmem:[%s5249_s3 + $0x6] ss:$0 sm:$0xff] }
 0x7f9   :  { %4092 = vmatprep.subr.bf16.mxu0 %v4342_v5 }
 0x7fb   :  { %4071 = vmatpush3.bf16.msra.mxu1 %v4301_v3  ;;  %v4335_v3 = vld [vmem:[%s5250_s5 + $0x20] sm:$0xff]  }
 0x7fc   :  { %4072 = vmatprep.subr.bf16.mxu1 %v4342_v5  ;;  %4093 = vmatpush3.bf16.msra.mxu0 %v4313_v20 }
 0x7fd   :  { %4094 = vmatprep.subr.bf16.mxu0 %v4342_v5 }
 0x7ff   :  { %4073 = vmatpush3.bf16.msra.mxu1 %v4302_v4  ;;  %v4336_v4 = vld [vmem:[%s5250_s5 + $0x18] sm:$0xff]  }
 0x800   :  { %4074 = vmatprep.subr.bf16.mxu1 %v4342_v5  ;;  %4095 = vmatpush3.bf16.msra.mxu0 %v4315_v22 }
 0x801   :  { %4096 = vmatprep.subr.bf16.mxu0 %v4342_v5 }
 0x803   :  { %4075 = vmatpush3.bf16.msra.mxu1 %v4303_v6  ;;  %v4337_v6 = vld [vmem:[%s5250_s5 + $0x10] sm:$0xff]  }
 0x804   :  { %4076 = vmatprep.subr.bf16.mxu1 %v4342_v5  ;;  %4097 = vmatpush3.bf16.msra.mxu0 %v4317_v24 }
 0x805   :  { %4098 = vmatprep.subr.bf16.mxu0 %v4342_v5 }
 0x807   :  { %4077 = vmatpush3.bf16.msra.mxu1 %v4304_v7  ;;  %v4338_v7 = vld [vmem:[%s5250_s5 + $0x8] sm:$0xff]  }
 0x808   :  { %4078 = vmatprep.subr.bf16.mxu1 %v4342_v5  ;;  %4099 = vmatpush3.bf16.msra.mxu0 %v4319_v26 }
 0x809   :  { %4100 = vmatprep.subr.bf16.mxu0 %v4342_v5 }
 0x80b   :  { %4079 = vmatpush3.bf16.msra.mxu1 %v4305_v12 }
 0x80c   :  { %4080 = vmatprep.subr.bf16.mxu1 %v4342_v5  ;;  %4101 = vmatpush3.bf16.msra.mxu0 %v4321_v29  ;;  %v2785_v29 = vld [vmem:[%s5247_s4] sm:$0x3] }
 0x80d   :  { %4102 = vmatprep.subr.bf16.mxu0 %v4342_v5 }
 0x80f   :  { %4081 = vmatpush3.bf16.msra.mxu1 %v4306_v8 }
 0x810   :  { %4082 = vmatprep.subr.bf16.mxu1 %v4342_v5  ;;  %4103 = vmatpush3.bf16.msra.mxu0 %v4323_v32 }
 0x811   :  { %4128 = vmatprep.subr.bf16.mxu0 %v4342_v5 }
 0x813   :  { %4083 = vmatpush3.bf16.msra.mxu1 %v4307_v10 }
 0x814   :  { %4108 = vmatprep.subr.bf16.mxu1 %v4342_v5 }
 0x816   :  { %4085 = vmatmul.mubr.msk.bf16.vlgmr.msra.gmra.mxu1 %vm3410_vm0, %v3411_v15 }
 0x817   :  { %4124 = vmatprep.mubr.msk.bf16.mxu1 %vm4343_vm13, %v4342_v5  ;;  %4109 = vmatpush3.bf16.msra.mxu1 %v4308_v16 }
 0x818   :  { %4110 = vmatprep.subr.bf16.mxu1 %v4342_v5 }
 0x81b   :  { %4111 = vmatpush3.bf16.msra.mxu1 %v4310_v31 }
 0x81c   :  { %4112 = vmatprep.subr.bf16.mxu1 %v4342_v5 }
 0x81f   :  { %4113 = vmatpush3.bf16.msra.mxu1 %v4312_v19 }
 0x820   :  { %4114 = vmatprep.subr.bf16.mxu1 %v4342_v5 }
 0x823   :  { %4115 = vmatpush3.bf16.msra.mxu1 %v4314_v21 }
 0x824   :  { %4116 = vmatprep.subr.bf16.mxu1 %v4342_v5 }
 0x827   :  { %4117 = vmatpush3.bf16.msra.mxu1 %v4316_v23 }
 0x828   :  { %4118 = vmatprep.subr.bf16.mxu1 %v4342_v5 }
 0x82b   :  { %4119 = vmatpush3.bf16.msra.mxu1 %v4318_v25 }
 0x82c   :  { %4120 = vmatprep.subr.bf16.mxu1 %v4342_v5 }
 0x82f   :  { %4121 = vmatpush3.bf16.msra.mxu1 %v4320_v27 }
 0x830   :  { %4122 = vmatprep.subr.bf16.mxu1 %v4342_v5 }
 0x833   :  { %4123 = vmatpush3.bf16.msra.mxu1 %v4322_v30  ;;  %v4339_v30 = vld [vmem:[%s5250_s5] sm:$0xff]  }
 0x834   :  { %4148 = vmatprep.subr.mxu1 %v4342_v5 }
 0x8b3   :  { %v2317_v33 = vpop.f32.mrf.mxu0 }
 0x8b5   :  { %v4066_v34 = vpop.f32.mrf.mxu0 }
 0x8b6   :  { %v2229_v35 = vpop.f32.mrf.mxu1 }
 0x8b7   :  { %v2320_v36 = vpop.f32.mrf.mxu0  ;;  %v2318_v41 = vadd.f32 %v2317_v33, %v2229_v35  ;;  %v14_v35 = vstv %s5251_s8 }
 0x8b8   :  { %v4046_v37 = vpop.f32.mrf.mxu1  ;;  %15 = vst [vmem:[#allocation2] sm:$0x1] %v14_v35  ;;  %v3497_v36 = vld [vmem:[%s5252_s6] ss:$0 sm:$0xff] }
 0x8b9   :  { %v4067_v38 = vpop.f32.mrf.mxu0 }
 0x8ba   :  { %v2232_v39 = vpop.f32.mrf.mxu1 }
 0x8bc   :  { %v4047_v40 = vpop.f32.mrf.mxu1 }
 0x8d6   :  { %v2423_v42 = vpop.f32.mrf.mxu1 }
 0x8d7   :  { %v2429_v44 = vadd.f32 %v2423_v42, %v2318_v41  ;;  %v3506_v42 = vld [vmem:[%s5253_s7] ss:$0 sm:$0xff] }
 0x8d8   :  { %v4086_v45 = vpop.f32.mrf.mxu1 }
 0x8d9   :  { %v2438_v46 = vadd.f32 %v3414_v43, %v2429_v44 }
 0x8da   :  { %v2426_v47 = vpop.f32.mrf.mxu1 }
 0x8db   :  { %v2439_v48 = vmul.f32 0.01, %v2438_v46  ;;  %v3507_v47 = vld [vmem:[#allocation2] ss:$0 sm:$0xff] }
 0x8dc   :  { %v4087_v49 = vpop.f32.mrf.mxu1 }
 0x8dd   :  { %v2440_v50 = vmax.f32 %v2438_v46, %v2439_v48 }
 0x8df   :  { %v2442_v51 = vrot.slane %v2440_v50, 7  ;;  %v2450_v52 = vpack.c.bf16 %v2440_v50, %v2440_v50  ;;  %v2446_v62 = vrot.slane %v2440_v50, 1 }
 0x8e1   :  { %v2444_v53 = vsel %vm366_vm2, 0.0, %v2442_v51  ;;  %4125 = vmatmul.mubr.bf16.vlgmr.msra.gmra.mxu1 %v2450_v52  ;;  %v2448_v63 = vsel %vm2107_vm14, %v2446_v62, 0.0  ;;  %vm2790_vm2 = vcmask 1043456  }
 0x8e2   :  { %v3456_v55 = vpack.c.bf16 %v2444_v53, %v2444_v53  ;;  %4150 = vmatprep.mubr.msk.f32.mxu1 %vm4343_vm13, %v4342_v5  ;;  %v3491_v0 = vpack.c.bf16 %v2448_v63, %v2448_v63 }
 0x8e4   :  { %4105 = vmatmul.mubr.msk.bf16.vlgmr.msra.gmra.mxu0 %vm3375_vm12, %v3456_v55 }
 0x8e5   :  { %4129 = vmatpush3.bf16.msra.mxu0 %v4324_v54  ;;  %4144 = vmatprep.mubr.msk.bf16.mxu0 %vm4343_vm13, %v4342_v5 }
 0x8e6   :  { %4130 = vmatprep.subr.bf16.mxu0 %v4342_v5 }
 0x8e9   :  { %4131 = vmatpush3.bf16.msra.mxu0 %v4325_v56 }
 0x8ea   :  { %4132 = vmatprep.subr.bf16.mxu0 %v4342_v5 }
 0x8ed   :  { %4133 = vmatpush3.bf16.msra.mxu0 %v4326_v57 }
 0x8ee   :  { %4134 = vmatprep.subr.bf16.mxu0 %v4342_v5 }
 0x8f1   :  { %4135 = vmatpush3.bf16.msra.mxu0 %v4327_v58 }
 0x8f2   :  { %4136 = vmatprep.subr.bf16.mxu0 %v4342_v5 }
 0x8f5   :  { %4137 = vmatpush3.bf16.msra.mxu0 %v4328_v59 }
 0x8f6   :  { %4138 = vmatprep.subr.bf16.mxu0 %v4342_v5 }
 0x8f9   :  { %4139 = vmatpush3.bf16.msra.mxu0 %v4329_v60 }
 0x8fa   :  { %4140 = vmatprep.subr.bf16.mxu0 %v4342_v5 }
 0x8fd   :  { %4141 = vmatpush3.bf16.msra.mxu0 %v4330_v61 }
 0x8fe   :  { %4142 = vmatprep.subr.bf16.mxu0 %v4342_v5 }
 0x901   :  { %4143 = vmatpush3.bf16.msra.mxu0 %v4331_v14 }
 0x902   :  { %4153 = vmatprep.subr.bf16.mxu0 %v4342_v5 }
 0x904   :  { %4145 = vmatmul.mubr.msk.bf16.vlgmr.msra.gmra.mxu0 %vm3410_vm0, %v3491_v0 }
 0x905   :  { %4169 = vmatprep.mubr.msk.bf16.mxu0 %vm4343_vm13, %v4342_v5  ;;  %4154 = vmatpush3.bf16.msra.mxu0 %v4332_v1  ;;  %vm2786_vm13 = vcmask 31744  }
 0x906   :  { %4155 = vmatprep.subr.bf16.mxu0 %v4342_v5 }
 0x909   :  { %4156 = vmatpush3.bf16.msra.mxu0 %v4333_v2 }
 0x90a   :  { %4157 = vmatprep.subr.bf16.mxu0 %v4342_v5 }
 0x90d   :  { %4158 = vmatpush3.bf16.msra.mxu0 %v4334_v28 }
 0x90e   :  { %4159 = vmatprep.subr.bf16.mxu0 %v4342_v5 }
 0x911   :  { %4160 = vmatpush3.bf16.msra.mxu0 %v4335_v3 }
 0x912   :  { %4161 = vmatprep.subr.bf16.mxu0 %v4342_v5 }
 0x915   :  { %4162 = vmatpush3.bf16.msra.mxu0 %v4336_v4 }
 0x916   :  { %4163 = vmatprep.subr.bf16.mxu0 %v4342_v5 }
 0x919   :  { %4164 = vmatpush3.bf16.msra.mxu0 %v4337_v6 }
 0x91a   :  { %4165 = vmatprep.subr.bf16.mxu0 %v4342_v5 }
 0x91d   :  { %4166 = vmatpush3.bf16.msra.mxu0 %v4338_v7 }
 0x91e   :  { %4167 = vmatprep.subr.bf16.mxu0 %v4342_v5 }
 0x921   :  { %4168 = vmatpush3.bf16.msra.mxu0 %v4339_v30 }
 0x9a1   :  { %v2656_v12 = vpop.f32.mrf.mxu1 }
 0x9a3   :  { %v4126_v8 = vpop.f32.mrf.mxu1 }
 0x9a4   :  { %v2568_v9 = vpop.f32.mrf.mxu0 }
 0x9a5   :  { %v2659_v10 = vpop.f32.mrf.mxu1  ;;  %v2657_v17 = vadd.f32 %v2656_v12, %v2568_v9 }
 0x9a6   :  { %v4106_v11 = vpop.f32.mrf.mxu0 }
 0x9a7   :  { %v4127_v13 = vpop.f32.mrf.mxu1 }
 0x9a8   :  { %v2571_v15 = vpop.f32.mrf.mxu0 }
 0x9aa   :  { %v4107_v16 = vpop.f32.mrf.mxu0 }
 0x9c4   :  { %v2762_v31 = vpop.f32.mrf.mxu0 }
 0x9c5   :  { %v2768_v19 = vadd.f32 %v2762_v31, %v2657_v17 }
 0x9c6   :  { %v4146_v20 = vpop.f32.mrf.mxu0 }
 0x9c7   :  { %v2777_v21 = vadd.f32 %v3494_v18, %v2768_v19 }
 0x9c8   :  { %v2765_v22 = vpop.f32.mrf.mxu0 }
 0x9c9   :  { %v2778_v23 = vmul.f32 0.01, %v2777_v21 }
 0x9ca   :  { %v4147_v5 = vpop.f32.mrf.mxu0 }
 0x9cb   :  { %v2779_v24 = vmax.f32 %v2777_v21, %v2778_v23 }
 0x9cd   :  { %v2781_v25 = vrot.slane %v2779_v24, 1 }
 0x9cf   :  { %v2783_v26 = vsel %vm2107_vm14, %v2781_v25, 0.0 }
 0x9d0   :  { %v2784_v27 = vmax.f32 %v2779_v24, %v2783_v26 }
 0x9d2   :  { %4149 = vmatpush3.msk.msra.mxu1 %vm2790_vm2, %v2784_v27 }
 0x9d3   :  { %4151 = vmatmul.mubr.msk.f32.vlgmr.msra.gmra.mxu1 %vm2786_vm13, %v2785_v29 }
 0xa93   :  { %v2860_v32 = vpop.f32.mrf.mxu1 }
 0xa94   :  { %v2864_v33 = vpack.c.bf16 %v2860_v32, %v2860_v32 }
 0xa95   :  { %v4152_v34 = vpop.f32.mrf.mxu1 }
 0xa96   :  { %4170 = vmatmul.mubr.bf16.vlgmr.msra.gmra.mxu0 %v2864_v33 }
 0xb56   :  { %v2970_v37 = vpop.f32.mrf.mxu0 }
 0xb57   :  { %v2971_v38 = vadd.f32 %v3497_v36, %v2970_v37 }
 0xb58   :  { %v4171_v39 = vpop.f32.mrf.mxu0 }
 0xb59   :  { %v2976_v40 = vmul.f32 0.01, %v2971_v38 }
 0xb5a   :  { %v2973_v41 = vpop.f32.mrf.mxu0 }
 0xb5b   :  { %v2977_v43 = vmax.f32 %v2971_v38, %v2976_v40 }
 0xb5c   :  { %v4172_v44 = vpop.f32.mrf.mxu0 }
 0xb5d   :  { %v2985_v45 = vmul.f32 %v3506_v42, %v2977_v43 }
 0xb5f   :  { %v2987_v46 = vsel %vm2986_vm3, %v2985_v45, 0.0 }
 0xb60   :  { %2988 = vadd.xlane.f32.xlu0 %v2987_v46 }
 0xbe9   :  { %v2989_v48 = vpop.xlane.xlu0 %2988 }
 0xbea   :  { %v2997_v49 = vadd.f32 %v3507_v47, %v2989_v48 }
 0xbec   :  { %2999 = vst.msk [vmem:[%s5254_s9] sm:$0x3] %vm2998_vm4, %v2997_v49 }

</bundles_post_ra>
